<compile_context>
chip_gen: v5e
topology: v5e:2x2
jax: 0.10.0
libtpu: 0.0.40
codegen_flags: <defaults>
</compile_context>

<pallas_src>
import functools

import jax
import jax.numpy as jnp
from jax.experimental import pallas as pl
from jax.experimental.pallas import tpu as pltpu

LANE = 128

# Slot indices inside the stacked state tensor (NUM_STATE, bs*n).
_OSC_V, _OSC_I, _OSC_CR, _TDE_V, _TDE_IT, _TDE_IF, _TDE_CR, _SPK_TDE = range(8)
NUM_STATE = 8


# ---------------------------------------------------------------------------
# Compile-time constant folding (shared by kernel and reference).
# ---------------------------------------------------------------------------
def _fold_params(params):
    """Fold the Euler-step constants.

    PyTorch update                               folded equivalent
      I += -dt*I/tau_syn + gain*in          ->   I = I*(1 - dt/tau_syn) + gain*in
      V += dt*(-V/tau + (I+steady)/C)       ->   V = V*(1 - dt/tau) + (I+steady)*dt/C
      i_trg += gain_trg*trg*i_fac*10000     ->   (gain_trg*10000) folded to one const
    (identical up to f32 rounding / associativity).
    """
    dt = float(params['clock_sim'])
    return dict(
        # OSC_neuron
        osc_i_decay=1.0 - dt / float(params['tau_Osc_Ie']),
        osc_gain=float(params['TDE_to_Osc_current']),
        osc_v_decay=1.0 - dt / float(params['tau_Osc']),
        osc_dt_over_c=dt / float(params['C_Osc']),
        osc_thr=float(params['v_Osc_threshold']),
        osc_refr=float(params['refrac_Osc']) / dt,
        osc_vr=float(params['reset_osc']),
        # TDE
        tde_fac_decay=1.0 - dt / float(params['tau_fac_TDE']),
        tde_gain_fac=float(params['gain_fac_TDE']),
        tde_trg_decay=1.0 - dt / float(params['tau_trg_TDE']),
        tde_gain_trg_1e4=float(params['gain_trg_TDE']) * 10000.0,
        tde_v_decay=1.0 - dt / float(params['tau_TDE']),
        tde_dt_over_c=dt / float(params['C_TDE']),
        tde_thr=float(params['v_TDE_threshold']),
        tde_refr=float(params['refrac_TDE']) / dt,
        tde_vr=float(params['reset_TDE']),
    )


# ---------------------------------------------------------------------------
# Fused, time-blocked sPLL kernel.
# Grid = (lane_tiles, T // t_unroll); time blocks are innermost.
# ---------------------------------------------------------------------------
def _spll_kernel(steady_ref, inp_ref, state_in_ref,
                 spk_tde_ref, spk_osc_ref, state_ref, *,
                 t_unroll,
                 osc_i_decay, osc_gain, osc_v_decay, osc_dt_over_c,
                 osc_thr, osc_refr, osc_vr,
                 tde_fac_decay, tde_gain_fac, tde_trg_decay, tde_gain_trg_1e4,
                 tde_v_decay, tde_dt_over_c, tde_thr, tde_refr, tde_vr):
    tb = pl.program_id(1)

    # Seed the VMEM-resident state block from the (aliased) initial state at
    # the first time block of each lane tile; it stays resident afterwards.
    @pl.when(tb == 0)
    def _():
        state_ref[...] = state_in_ref[...]

    steady = steady_ref[0]                    # (tile_l,) — hoisted out of loop

    # Load the recurrent state ONCE per time block; carry as values.
    osc_V = state_ref[_OSC_V]
    osc_I = state_ref[_OSC_I]
    osc_cr = state_ref[_OSC_CR]
    tde_v = state_ref[_TDE_V]
    tde_it = state_ref[_TDE_IT]
    tde_if = state_ref[_TDE_IF]
    tde_cr = state_ref[_TDE_CR]
    spk_tde = state_ref[_SPK_TDE] > 0.5       # bool

    for step in range(t_unroll):              # static unroll over the block
        inp = inp_ref[step]                   # (tile_l,) external input

        # ---- OSC_neuron (input = previous-step TDE spikes) ----------------
        osc_I = osc_I * osc_i_decay + jnp.where(spk_tde, osc_gain, 0.0)
        osc_V = osc_V * osc_v_decay + (osc_I + steady) * osc_dt_over_c
        spk_osc = osc_V > osc_thr             # == (V - thr > 0) in IEEE f32
        osc_cr = jnp.where(spk_osc, osc_refr, osc_cr - 1.0)
        osc_V = jnp.where(spk_osc, osc_vr,
                          jnp.where(osc_cr <= 0.0, osc_V, 0.0))

        # ---- TDE (trigger = OSC spikes this step, fac = external input) ---
        tde_if = tde_if * tde_fac_decay + tde_gain_fac * inp
        tde_it = tde_it * tde_trg_decay + jnp.where(
            spk_osc, tde_gain_trg_1e4 * tde_if, 0.0)
        tde_v = tde_v * tde_v_decay + tde_it * tde_dt_over_c
        spk_tde = tde_v > tde_thr
        tde_cr = jnp.where(spk_tde, tde_refr, tde_cr - 1.0)
        tde_v = jnp.where(spk_tde, tde_vr,
                          jnp.where(tde_cr <= 0.0, tde_v, 0.0))

        # Per-step spike rows into the (t_unroll, tile_l) output slabs.
        spk_osc_ref[step] = spk_osc.astype(jnp.float32)
        spk_tde_ref[step] = spk_tde.astype(jnp.float32)

    # Write the recurrent state back once per time block.
    state_ref[_OSC_V] = osc_V
    state_ref[_OSC_I] = osc_I
    state_ref[_OSC_CR] = osc_cr
    state_ref[_TDE_V] = tde_v
    state_ref[_TDE_IT] = tde_it
    state_ref[_TDE_IF] = tde_if
    state_ref[_TDE_CR] = tde_cr
    state_ref[_SPK_TDE] = spk_tde.astype(jnp.float32)


# ---------------------------------------------------------------------------
# Wrapper: flattens (bs, n) into one lane-dense axis, time-blocks the
# recurrence, runs T fused steps, and unflattens / un-pads the results.
# ---------------------------------------------------------------------------
def _pick_t_unroll(T, requested):
    # Divisor of T that is a multiple of 8 (f32 sublane tile) or T itself.
    for d in range(min(T, requested), 0, -1):
        if T % d == 0 and (d % 8 == 0 or d == T):
            return d
    return T


def _default_lane_tiles():
    # Shard the lane axis across both TensorCores on v7x only.
    try:
        return 2 if "v7" in jax.devices()[0].device_kind.lower() else 1
    except Exception:
        return 1


def spll_forward(inp_seq, state0, steady_current, params, *,
                 t_unroll=16, lane_tiles=None):
    """Run T fused sPLL steps.

    inp_seq        : (T, bs, n) f32  external input (TDE facilitatory synapse)
    state0         : (NUM_STATE, bs, n) f32 stacked state
                     [OSC_V, OSC_I, OSC_cr, TDE_v, TDE_i_trg, TDE_i_fac,
                      TDE_cr, spikes_TDE_prev]
    steady_current : (n,) f32
    returns (spk_TDE_seq, spk_OSC_seq, final_state), shapes
            (T, bs, n), (T, bs, n), (NUM_STATE, bs, n).
    """
    T, bs, n = inp_seq.shape
    if lane_tiles is None:
        lane_tiles = _default_lane_tiles()
    tu = _pick_t_unroll(T, t_unroll)
    grid_t = T // tu

    # Flatten (bs, n) -> one lane-major axis, padded so each lane tile is a
    # multiple of 128 (fully lane-dense loads/stores, no sublane waste from
    # a tiny batch dim).
    L = bs * n
    chunk = LANE * lane_tiles
    L_pad = max(chunk, ((L + chunk - 1) // chunk) * chunk)
    tile_l = L_pad // lane_tiles
    pad = L_pad - L

    inp_p = jnp.pad(inp_seq.astype(jnp.float32).reshape(T, L),
                    ((0, 0), (0, pad)))
    state_p = jnp.pad(state0.astype(jnp.float32).reshape(NUM_STATE, L),
                      ((0, 0), (0, pad)))
    # Pre-tile the steady current over the batch once at trace time.
    steady_p = jnp.pad(jnp.tile(steady_current.astype(jnp.float32), bs),
                       ((0, pad),)).reshape(1, L_pad)

    kernel = functools.partial(_spll_kernel, t_unroll=tu,
                               **_fold_params(params))

    spk_sds = jax.ShapeDtypeStruct((T, L_pad), jnp.float32)
    state_sds = jax.ShapeDtypeStruct((NUM_STATE, L_pad), jnp.float32)

    # Grid: lane tiles (parallel, megacore on v7x) x time blocks (arbitrary,
    # sequential recurrence, innermost so the state block stays VMEM-resident).
    grid = (lane_tiles, grid_t)
    steady_spec = pl.BlockSpec((1, tile_l), lambda s, tb: (0, s))
    seq_spec = pl.BlockSpec((tu, tile_l), lambda s, tb: (tb, s))
    state_spec = pl.BlockSpec((NUM_STATE, tile_l), lambda s, tb: (0, s))

    # VMEM budget per lane tile: resident state + double-buffered input and
    # two spike-output slabs.  Keeps us far below v7x's 64 MiB / core.
    vmem_bytes = 4 * tile_l * (2 * NUM_STATE + 2 * 3 * tu)
    assert vmem_bytes < 24 * 1024 * 1024, "time block too large for VMEM"

    spk_tde, spk_osc, state_T = pl.pallas_call(
        kernel,
        grid=grid,
        in_specs=[steady_spec, seq_spec, state_spec],
        out_specs=[seq_spec, seq_spec, state_spec],
        out_shape=[spk_sds, spk_sds, state_sds],
        input_output_aliases={2: 2},   # update the state buffer in place
        compiler_params=pltpu.CompilerParams(
            dimension_semantics=("parallel", "arbitrary")),
    )(steady_p, inp_p, state_p)

    spk_tde = spk_tde[:, :L].reshape(T, bs, n)
    spk_osc = spk_osc[:, :L].reshape(T, bs, n)
    state_T = state_T[:, :L].reshape(NUM_STATE, bs, n)
    return spk_tde, spk_osc, state_T


# ---------------------------------------------------------------------------
# Pure-JAX reference (lax.scan).  Same recurrence and folded constants as the
# kernel; algebraically identical to the PyTorch module's update, differing
# only in f32 rounding/associativity of the folded constants.
# ---------------------------------------------------------------------------
def spll_forward_ref(inp_seq, state0, steady_current, params):
    c = _fold_params(params)
    steady = steady_current[None, :].astype(jnp.float32)

    def step(state, inp):
        osc_V, osc_I, osc_cr, tde_v, tde_it, tde_if, tde_cr, spk_tde_prev = state
        spk_tde_b = spk_tde_prev > 0.5
        # OSC_neuron (input = previous-step TDE spikes)
        osc_I = osc_I * c['osc_i_decay'] + jnp.where(spk_tde_b, c['osc_gain'], 0.0)
        osc_V = osc_V * c['osc_v_decay'] + (osc_I + steady) * c['osc_dt_over_c']
        spk_osc = osc_V > c['osc_thr']
        osc_cr = jnp.where(spk_osc, c['osc_refr'], osc_cr - 1.0)
        osc_V = jnp.where(spk_osc, c['osc_vr'],
                          jnp.where(osc_cr <= 0.0, osc_V, 0.0))
        # TDE (trigger = OSC spikes this step, fac = external input)
        tde_if = tde_if * c['tde_fac_decay'] + c['tde_gain_fac'] * inp
        tde_it = tde_it * c['tde_trg_decay'] + jnp.where(
            spk_osc, c['tde_gain_trg_1e4'] * tde_if, 0.0)
        tde_v = tde_v * c['tde_v_decay'] + tde_it * c['tde_dt_over_c']
        spk_tde = tde_v > c['tde_thr']
        tde_cr = jnp.where(spk_tde, c['tde_refr'], tde_cr - 1.0)
        tde_v = jnp.where(spk_tde, c['tde_vr'],
                          jnp.where(tde_cr <= 0.0, tde_v, 0.0))
        spk_tde_f = spk_tde.astype(jnp.float32)
        spk_osc_f = spk_osc.astype(jnp.float32)
        new_state = (osc_V, osc_I, osc_cr, tde_v, tde_it, tde_if, tde_cr,
                     spk_tde_f)
        return new_state, (spk_tde_f, spk_osc_f)

    state0_t = tuple(state0[i].astype(jnp.float32) for i in range(NUM_STATE))
    stateT, (spk_tde_seq, spk_osc_seq) = jax.lax.scan(
        step, state0_t, inp_seq.astype(jnp.float32))
    return spk_tde_seq, spk_osc_seq, jnp.stack(stateT, axis=0)


if __name__ == "__main__":
    bs = 2      # trials_per_stimulus
    n = 32      # neurons_n
    T = 32      # simulation steps (4 time blocks of t_unroll=8)

    params = dict(
        clock_sim=1e-3, neurons_n=n, trials_per_stimulus=bs,
        # OSC_neuron
        C_Osc=1e-3, v_Osc_threshold=1.5, tau_Osc_Ie=5e-3, tau_Osc=10e-3,
        TDE_to_Osc_current=1.0, reset_osc=0.0,
        I_minimum_osc=0.5, I_step_osc=0.05, refrac_Osc=3e-3,
        # TDE
        C_TDE=1e-3, v_TDE_threshold=0.8, tau_trg_TDE=5e-3, tau_fac_TDE=20e-3,
        gain_fac_TDE=1.0, gain_trg_TDE=1e-4, tau_TDE=10e-3,
        reset_TDE=0.0, refrac_TDE=2e-3,
    )

    # sPLL.initialize_state: steady_current = linspace(I_min, I_min + I_step*n, n)
    steady = jnp.linspace(params['I_minimum_osc'],
                          params['I_minimum_osc'] + params['I_step_osc'] * n,
                          n, dtype=jnp.float32)

    key = jax.random.PRNGKey(0)
    # External spike train driving the TDE facilitatory synapse.
    inp_seq = (jax.random.uniform(key, (T, bs, n), dtype=jnp.float32) < 0.3
               ).astype(jnp.float32)

    # Initial module state: OSC V = 1, everything else 0 (incl. spikes_TDE_prev).
    state0 = jnp.zeros((NUM_STATE, bs, n), jnp.float32).at[_OSC_V].set(1.0)

    spk_tde, spk_osc, state_T = spll_forward(inp_seq, state0, steady, params,
                                             t_unroll=8)
    jax.block_until_ready((spk_tde, spk_osc, state_T))

    spk_tde_r, spk_osc_r, state_T_r = spll_forward_ref(inp_seq, state0,
                                                       steady, params)

    assert jnp.array_equal(spk_osc, spk_osc_r), "OSC spike mismatch"
    assert jnp.array_equal(spk_tde, spk_tde_r), "TDE spike mismatch"
    assert jnp.allclose(state_T, state_T_r, atol=1e-4, rtol=1e-4), \
        "final state mismatch"
    assert bool(spk_osc.sum() > 0) and bool(spk_tde.sum() > 0), \
        "test parameters should exercise the spiking/refractory path"

    print("KERNEL_OK")
</pallas_src>

<mosaic_0001>
module attributes {stable_mosaic.version = 11 : i64} {
  func.func @_spll_kernel(%arg0: i32, %arg1: i32, %arg2: memref<1x128xf32, #tpu.memory_space<vmem>>, %arg3: memref<8x128xf32, #tpu.memory_space<vmem>>, %arg4: memref<8x128xf32, #tpu.memory_space<vmem>>, %arg5: memref<8x128xf32, #tpu.memory_space<vmem>>, %arg6: memref<8x128xf32, #tpu.memory_space<vmem>>, %arg7: memref<8x128xf32, #tpu.memory_space<vmem>>) attributes {dimension_semantics = [#tpu.dimension_semantics<parallel>, #tpu.dimension_semantics<arbitrary>], iteration_bounds = array<i64: 1, 4>, scalar_prefetch = 0 : i64, scratch_operands = 0 : i64, tpu.core_type = #tpu.core_type<tc>, window_params = [{transform_indices = @transform_0, window_bounds = array<i64: 1, 128>}, {transform_indices = @transform_1, window_bounds = array<i64: 8, 128>}, {transform_indices = @transform_2, window_bounds = array<i64: 8, 128>}, {transform_indices = @transform_3, window_bounds = array<i64: 8, 128>}, {transform_indices = @transform_4, window_bounds = array<i64: 8, 128>}, {transform_indices = @transform_5, window_bounds = array<i64: 8, 128>}]} {
    %c0_i32 = arith.constant 0 : i32
    %0 = arith.cmpi eq, %arg1, %c0_i32 : i32
    %1 = arith.extui %0 : i1 to i32
    %c0_i32_0 = arith.constant 0 : i32
    %2 = arith.cmpi ne, %1, %c0_i32_0 : i32
    scf.if %2 {
      %c0_267 = arith.constant 0 : index
      %c0_268 = arith.constant 0 : index
      %569 = vector.load %arg4[%c0_267, %c0_268] : memref<8x128xf32, #tpu.memory_space<vmem>>, vector<8x128xf32>
      %c0_269 = arith.constant 0 : index
      %c0_270 = arith.constant 0 : index
      %570 = vector.load %arg7[%c0_269, %c0_270] : memref<8x128xf32, #tpu.memory_space<vmem>>, vector<8x128xf32>
      tpu.vector_store %arg7[%c0_269, %c0_270], %569 {strides = array<i32>} : memref<8x128xf32, #tpu.memory_space<vmem>>, vector<8x128xf32>,
    } else {
    }
    %c0 = arith.constant 0 : index
    %c0_1 = arith.constant 0 : index
    %3 = vector.load %arg2[%c0, %c0_1] : memref<1x128xf32, #tpu.memory_space<vmem>>, vector<1x128xf32>
    %4 = vector.shape_cast %3 : vector<1x128xf32> to vector<128xf32>
    %c0_2 = arith.constant 0 : index
    %c0_3 = arith.constant 0 : index
    %5 = vector.load %arg7[%c0_2, %c0_3] : memref<8x128xf32, #tpu.memory_space<vmem>>, vector<1x128xf32>
    %6 = vector.shape_cast %5 : vector<1x128xf32> to vector<128xf32>
    %c1 = arith.constant 1 : index
    %c0_4 = arith.constant 0 : index
    %7 = vector.load %arg7[%c1, %c0_4] : memref<8x128xf32, #tpu.memory_space<vmem>>, vector<1x128xf32>
    %8 = vector.shape_cast %7 : vector<1x128xf32> to vector<128xf32>
    %c2 = arith.constant 2 : index
    %c0_5 = arith.constant 0 : index
    %9 = vector.load %arg7[%c2, %c0_5] : memref<8x128xf32, #tpu.memory_space<vmem>>, vector<1x128xf32>
    %10 = vector.shape_cast %9 : vector<1x128xf32> to vector<128xf32>
    %c3 = arith.constant 3 : index
    %c0_6 = arith.constant 0 : index
    %11 = vector.load %arg7[%c3, %c0_6] : memref<8x128xf32, #tpu.memory_space<vmem>>, vector<1x128xf32>
    %12 = vector.shape_cast %11 : vector<1x128xf32> to vector<128xf32>
    %c4 = arith.constant 4 : index
    %c0_7 = arith.constant 0 : index
    %13 = vector.load %arg7[%c4, %c0_7] : memref<8x128xf32, #tpu.memory_space<vmem>>, vector<1x128xf32>
    %14 = vector.shape_cast %13 : vector<1x128xf32> to vector<128xf32>
    %c5 = arith.constant 5 : index
    %c0_8 = arith.constant 0 : index
    %15 = vector.load %arg7[%c5, %c0_8] : memref<8x128xf32, #tpu.memory_space<vmem>>, vector<1x128xf32>
    %16 = vector.shape_cast %15 : vector<1x128xf32> to vector<128xf32>
    %c6 = arith.constant 6 : index
    %c0_9 = arith.constant 0 : index
    %17 = vector.load %arg7[%c6, %c0_9] : memref<8x128xf32, #tpu.memory_space<vmem>>, vector<1x128xf32>
    %18 = vector.shape_cast %17 : vector<1x128xf32> to vector<128xf32>
    %c7 = arith.constant 7 : index
    %c0_10 = arith.constant 0 : index
    %19 = vector.load %arg7[%c7, %c0_10] : memref<8x128xf32, #tpu.memory_space<vmem>>, vector<1x128xf32>
    %20 = vector.shape_cast %19 : vector<1x128xf32> to vector<128xf32>
    %cst = arith.constant 5.000000e-01 : f32
    %21 = vector.broadcast %cst : f32 to vector<128xf32>
    %22 = arith.cmpf ogt, %20, %21 : vector<128xf32>
    %c0_11 = arith.constant 0 : index
    %c0_12 = arith.constant 0 : index
    %23 = vector.load %arg3[%c0_11, %c0_12] : memref<8x128xf32, #tpu.memory_space<vmem>>, vector<1x128xf32>
    %24 = vector.shape_cast %23 : vector<1x128xf32> to vector<128xf32>
    %cst_13 = arith.constant 8.000000e-01 : f32
    %25 = vector.broadcast %cst_13 : f32 to vector<128xf32>
    %26 = arith.mulf %8, %25 : vector<128xf32>
    %cst_14 = arith.constant 1.000000e+00 : f32
    %cst_15 = arith.constant 0.000000e+00 : f32
    %27 = vector.broadcast %cst_14 : f32 to vector<128xf32>
    %28 = vector.broadcast %cst_15 : f32 to vector<128xf32>
    %29 = arith.select %22, %27, %28 : vector<128xi1>, vector<128xf32>
    %30 = arith.addf %26, %29 : vector<128xf32>
    %cst_16 = arith.constant 0.899999976 : f32
    %31 = vector.broadcast %cst_16 : f32 to vector<128xf32>
    %32 = arith.mulf %6, %31 : vector<128xf32>
    %33 = arith.addf %30, %4 : vector<128xf32>
    %cst_17 = arith.constant 1.000000e+00 : f32
    %34 = vector.broadcast %cst_17 : f32 to vector<128xf32>
    %35 = arith.mulf %33, %34 : vector<128xf32>
    %36 = arith.addf %32, %35 : vector<128xf32>
    %cst_18 = arith.constant 1.500000e+00 : f32
    %37 = vector.broadcast %cst_18 : f32 to vector<128xf32>
    %38 = arith.cmpf ogt, %36, %37 : vector<128xf32>
    %cst_19 = arith.constant 1.000000e+00 : f32
    %39 = vector.broadcast %cst_19 : f32 to vector<128xf32>
    %40 = arith.subf %10, %39 : vector<128xf32>
    %cst_20 = arith.constant 3.000000e+00 : f32
    %41 = vector.broadcast %cst_20 : f32 to vector<128xf32>
    %42 = arith.select %38, %41, %40 : vector<128xi1>, vector<128xf32>
    %cst_21 = arith.constant 0.000000e+00 : f32
    %43 = vector.broadcast %cst_21 : f32 to vector<128xf32>
    %44 = arith.cmpf ole, %42, %43 : vector<128xf32>
    %cst_22 = arith.constant 0.000000e+00 : f32
    %45 = vector.broadcast %cst_22 : f32 to vector<128xf32>
    %46 = arith.select %44, %36, %45 : vector<128xi1>, vector<128xf32>
    %cst_23 = arith.constant 0.000000e+00 : f32
    %47 = vector.broadcast %cst_23 : f32 to vector<128xf32>
    %48 = arith.select %38, %47, %46 : vector<128xi1>, vector<128xf32>
    %cst_24 = arith.constant 0.949999988 : f32
    %49 = vector.broadcast %cst_24 : f32 to vector<128xf32>
    %50 = arith.mulf %16, %49 : vector<128xf32>
    %cst_25 = arith.constant 1.000000e+00 : f32
    %51 = vector.broadcast %cst_25 : f32 to vector<128xf32>
    %52 = arith.mulf %51, %24 : vector<128xf32>
    %53 = arith.addf %50, %52 : vector<128xf32>
    %cst_26 = arith.constant 8.000000e-01 : f32
    %54 = vector.broadcast %cst_26 : f32 to vector<128xf32>
    %55 = arith.mulf %14, %54 : vector<128xf32>
    %cst_27 = arith.constant 1.000000e+00 : f32
    %56 = vector.broadcast %cst_27 : f32 to vector<128xf32>
    %57 = arith.mulf %56, %53 : vector<128xf32>
    %cst_28 = arith.constant 0.000000e+00 : f32
    %58 = vector.broadcast %cst_28 : f32 to vector<128xf32>
    %59 = arith.select %38, %57, %58 : vector<128xi1>, vector<128xf32>
    %60 = arith.addf %55, %59 : vector<128xf32>
    %cst_29 = arith.constant 0.899999976 : f32
    %61 = vector.broadcast %cst_29 : f32 to vector<128xf32>
    %62 = arith.mulf %12, %61 : vector<128xf32>
    %cst_30 = arith.constant 1.000000e+00 : f32
    %63 = vector.broadcast %cst_30 : f32 to vector<128xf32>
    %64 = arith.mulf %60, %63 : vector<128xf32>
    %65 = arith.addf %62, %64 : vector<128xf32>
    %cst_31 = arith.constant 8.000000e-01 : f32
    %66 = vector.broadcast %cst_31 : f32 to vector<128xf32>
    %67 = arith.cmpf ogt, %65, %66 : vector<128xf32>
    %cst_32 = arith.constant 1.000000e+00 : f32
    %68 = vector.broadcast %cst_32 : f32 to vector<128xf32>
    %69 = arith.subf %18, %68 : vector<128xf32>
    %cst_33 = arith.constant 2.000000e+00 : f32
    %70 = vector.broadcast %cst_33 : f32 to vector<128xf32>
    %71 = arith.select %67, %70, %69 : vector<128xi1>, vector<128xf32>
    %cst_34 = arith.constant 0.000000e+00 : f32
    %72 = vector.broadcast %cst_34 : f32 to vector<128xf32>
    %73 = arith.cmpf ole, %71, %72 : vector<128xf32>
    %cst_35 = arith.constant 0.000000e+00 : f32
    %74 = vector.broadcast %cst_35 : f32 to vector<128xf32>
    %75 = arith.select %73, %65, %74 : vector<128xi1>, vector<128xf32>
    %cst_36 = arith.constant 0.000000e+00 : f32
    %76 = vector.broadcast %cst_36 : f32 to vector<128xf32>
    %77 = arith.select %67, %76, %75 : vector<128xi1>, vector<128xf32>
    %78 = arith.extui %38 : vector<128xi1> to vector<128xi32>
    %79 = arith.sitofp %78 : vector<128xi32> to vector<128xf32>
    %c0_37 = arith.constant 0 : index
    %c0_38 = arith.constant 0 : index
    %80 = vector.load %arg6[%c0_37, %c0_38] : memref<8x128xf32, #tpu.memory_space<vmem>>, vector<1x128xf32>
    %81 = vector.shape_cast %80 : vector<1x128xf32> to vector<128xf32>
    %82 = vector.shape_cast %79 : vector<128xf32> to vector<1x128xf32>
    tpu.vector_store %arg6[%c0_37, %c0_38], %82 {strides = array<i32>} : memref<8x128xf32, #tpu.memory_space<vmem>>, vector<1x128xf32>,
    %83 = arith.extui %67 : vector<128xi1> to vector<128xi32>
    %84 = arith.sitofp %83 : vector<128xi32> to vector<128xf32>
    %c0_39 = arith.constant 0 : index
    %c0_40 = arith.constant 0 : index
    %85 = vector.load %arg5[%c0_39, %c0_40] : memref<8x128xf32, #tpu.memory_space<vmem>>, vector<1x128xf32>
    %86 = vector.shape_cast %85 : vector<1x128xf32> to vector<128xf32>
    %87 = vector.shape_cast %84 : vector<128xf32> to vector<1x128xf32>
    tpu.vector_store %arg5[%c0_39, %c0_40], %87 {strides = array<i32>} : memref<8x128xf32, #tpu.memory_space<vmem>>, vector<1x128xf32>,
    %c1_41 = arith.constant 1 : index
    %c0_42 = arith.constant 0 : index
    %88 = vector.load %arg3[%c1_41, %c0_42] : memref<8x128xf32, #tpu.memory_space<vmem>>, vector<1x128xf32>
    %89 = vector.shape_cast %88 : vector<1x128xf32> to vector<128xf32>
    %cst_43 = arith.constant 8.000000e-01 : f32
    %90 = vector.broadcast %cst_43 : f32 to vector<128xf32>
    %91 = arith.mulf %30, %90 : vector<128xf32>
    %cst_44 = arith.constant 1.000000e+00 : f32
    %cst_45 = arith.constant 0.000000e+00 : f32
    %92 = vector.broadcast %cst_44 : f32 to vector<128xf32>
    %93 = vector.broadcast %cst_45 : f32 to vector<128xf32>
    %94 = arith.select %67, %92, %93 : vector<128xi1>, vector<128xf32>
    %95 = arith.addf %91, %94 : vector<128xf32>
    %cst_46 = arith.constant 0.899999976 : f32
    %96 = vector.broadcast %cst_46 : f32 to vector<128xf32>
    %97 = arith.mulf %48, %96 : vector<128xf32>
    %98 = arith.addf %95, %4 : vector<128xf32>
    %cst_47 = arith.constant 1.000000e+00 : f32
    %99 = vector.broadcast %cst_47 : f32 to vector<128xf32>
    %100 = arith.mulf %98, %99 : vector<128xf32>
    %101 = arith.addf %97, %100 : vector<128xf32>
    %cst_48 = arith.constant 1.500000e+00 : f32
    %102 = vector.broadcast %cst_48 : f32 to vector<128xf32>
    %103 = arith.cmpf ogt, %101, %102 : vector<128xf32>
    %cst_49 = arith.constant 1.000000e+00 : f32
    %104 = vector.broadcast %cst_49 : f32 to vector<128xf32>
    %105 = arith.subf %42, %104 : vector<128xf32>
    %cst_50 = arith.constant 3.000000e+00 : f32
    %106 = vector.broadcast %cst_50 : f32 to vector<128xf32>
    %107 = arith.select %103, %106, %105 : vector<128xi1>, vector<128xf32>
    %cst_51 = arith.constant 0.000000e+00 : f32
    %108 = vector.broadcast %cst_51 : f32 to vector<128xf32>
    %109 = arith.cmpf ole, %107, %108 : vector<128xf32>
    %cst_52 = arith.constant 0.000000e+00 : f32
    %110 = vector.broadcast %cst_52 : f32 to vector<128xf32>
    %111 = arith.select %109, %101, %110 : vector<128xi1>, vector<128xf32>
    %cst_53 = arith.constant 0.000000e+00 : f32
    %112 = vector.broadcast %cst_53 : f32 to vector<128xf32>
    %113 = arith.select %103, %112, %111 : vector<128xi1>, vector<128xf32>
    %cst_54 = arith.constant 0.949999988 : f32
    %114 = vector.broadcast %cst_54 : f32 to vector<128xf32>
    %115 = arith.mulf %53, %114 : vector<128xf32>
    %cst_55 = arith.constant 1.000000e+00 : f32
    %116 = vector.broadcast %cst_55 : f32 to vector<128xf32>
    %117 = arith.mulf %116, %89 : vector<128xf32>
    %118 = arith.addf %115, %117 : vector<128xf32>
    %cst_56 = arith.constant 8.000000e-01 : f32
    %119 = vector.broadcast %cst_56 : f32 to vector<128xf32>
    %120 = arith.mulf %60, %119 : vector<128xf32>
    %cst_57 = arith.constant 1.000000e+00 : f32
    %121 = vector.broadcast %cst_57 : f32 to vector<128xf32>
    %122 = arith.mulf %121, %118 : vector<128xf32>
    %cst_58 = arith.constant 0.000000e+00 : f32
    %123 = vector.broadcast %cst_58 : f32 to vector<128xf32>
    %124 = arith.select %103, %122, %123 : vector<128xi1>, vector<128xf32>
    %125 = arith.addf %120, %124 : vector<128xf32>
    %cst_59 = arith.constant 0.899999976 : f32
    %126 = vector.broadcast %cst_59 : f32 to vector<128xf32>
    %127 = arith.mulf %77, %126 : vector<128xf32>
    %cst_60 = arith.constant 1.000000e+00 : f32
    %128 = vector.broadcast %cst_60 : f32 to vector<128xf32>
    %129 = arith.mulf %125, %128 : vector<128xf32>
    %130 = arith.addf %127, %129 : vector<128xf32>
    %cst_61 = arith.constant 8.000000e-01 : f32
    %131 = vector.broadcast %cst_61 : f32 to vector<128xf32>
    %132 = arith.cmpf ogt, %130, %131 : vector<128xf32>
    %cst_62 = arith.constant 1.000000e+00 : f32
    %133 = vector.broadcast %cst_62 : f32 to vector<128xf32>
    %134 = arith.subf %71, %133 : vector<128xf32>
    %cst_63 = arith.constant 2.000000e+00 : f32
    %135 = vector.broadcast %cst_63 : f32 to vector<128xf32>
    %136 = arith.select %132, %135, %134 : vector<128xi1>, vector<128xf32>
    %cst_64 = arith.constant 0.000000e+00 : f32
    %137 = vector.broadcast %cst_64 : f32 to vector<128xf32>
    %138 = arith.cmpf ole, %136, %137 : vector<128xf32>
    %cst_65 = arith.constant 0.000000e+00 : f32
    %139 = vector.broadcast %cst_65 : f32 to vector<128xf32>
    %140 = arith.select %138, %130, %139 : vector<128xi1>, vector<128xf32>
    %cst_66 = arith.constant 0.000000e+00 : f32
    %141 = vector.broadcast %cst_66 : f32 to vector<128xf32>
    %142 = arith.select %132, %141, %140 : vector<128xi1>, vector<128xf32>
    %143 = arith.extui %103 : vector<128xi1> to vector<128xi32>
    %144 = arith.sitofp %143 : vector<128xi32> to vector<128xf32>
    %c1_67 = arith.constant 1 : index
    %c0_68 = arith.constant 0 : index
    %145 = vector.load %arg6[%c1_67, %c0_68] : memref<8x128xf32, #tpu.memory_space<vmem>>, vector<1x128xf32>
    %146 = vector.shape_cast %145 : vector<1x128xf32> to vector<128xf32>
    %147 = vector.shape_cast %144 : vector<128xf32> to vector<1x128xf32>
    tpu.vector_store %arg6[%c1_67, %c0_68], %147 {strides = array<i32>} : memref<8x128xf32, #tpu.memory_space<vmem>>, vector<1x128xf32>,
    %148 = arith.extui %132 : vector<128xi1> to vector<128xi32>
    %149 = arith.sitofp %148 : vector<128xi32> to vector<128xf32>
    %c1_69 = arith.constant 1 : index
    %c0_70 = arith.constant 0 : index
    %150 = vector.load %arg5[%c1_69, %c0_70] : memref<8x128xf32, #tpu.memory_space<vmem>>, vector<1x128xf32>
    %151 = vector.shape_cast %150 : vector<1x128xf32> to vector<128xf32>
    %152 = vector.shape_cast %149 : vector<128xf32> to vector<1x128xf32>
    tpu.vector_store %arg5[%c1_69, %c0_70], %152 {strides = array<i32>} : memref<8x128xf32, #tpu.memory_space<vmem>>, vector<1x128xf32>,
    %c2_71 = arith.constant 2 : index
    %c0_72 = arith.constant 0 : index
    %153 = vector.load %arg3[%c2_71, %c0_72] : memref<8x128xf32, #tpu.memory_space<vmem>>, vector<1x128xf32>
    %154 = vector.shape_cast %153 : vector<1x128xf32> to vector<128xf32>
    %cst_73 = arith.constant 8.000000e-01 : f32
    %155 = vector.broadcast %cst_73 : f32 to vector<128xf32>
    %156 = arith.mulf %95, %155 : vector<128xf32>
    %cst_74 = arith.constant 1.000000e+00 : f32
    %cst_75 = arith.constant 0.000000e+00 : f32
    %157 = vector.broadcast %cst_74 : f32 to vector<128xf32>
    %158 = vector.broadcast %cst_75 : f32 to vector<128xf32>
    %159 = arith.select %132, %157, %158 : vector<128xi1>, vector<128xf32>
    %160 = arith.addf %156, %159 : vector<128xf32>
    %cst_76 = arith.constant 0.899999976 : f32
    %161 = vector.broadcast %cst_76 : f32 to vector<128xf32>
    %162 = arith.mulf %113, %161 : vector<128xf32>
    %163 = arith.addf %160, %4 : vector<128xf32>
    %cst_77 = arith.constant 1.000000e+00 : f32
    %164 = vector.broadcast %cst_77 : f32 to vector<128xf32>
    %165 = arith.mulf %163, %164 : vector<128xf32>
    %166 = arith.addf %162, %165 : vector<128xf32>
    %cst_78 = arith.constant 1.500000e+00 : f32
    %167 = vector.broadcast %cst_78 : f32 to vector<128xf32>
    %168 = arith.cmpf ogt, %166, %167 : vector<128xf32>
    %cst_79 = arith.constant 1.000000e+00 : f32
    %169 = vector.broadcast %cst_79 : f32 to vector<128xf32>
    %170 = arith.subf %107, %169 : vector<128xf32>
    %cst_80 = arith.constant 3.000000e+00 : f32
    %171 = vector.broadcast %cst_80 : f32 to vector<128xf32>
    %172 = arith.select %168, %171, %170 : vector<128xi1>, vector<128xf32>
    %cst_81 = arith.constant 0.000000e+00 : f32
    %173 = vector.broadcast %cst_81 : f32 to vector<128xf32>
    %174 = arith.cmpf ole, %172, %173 : vector<128xf32>
    %cst_82 = arith.constant 0.000000e+00 : f32
    %175 = vector.broadcast %cst_82 : f32 to vector<128xf32>
    %176 = arith.select %174, %166, %175 : vector<128xi1>, vector<128xf32>
    %cst_83 = arith.constant 0.000000e+00 : f32
    %177 = vector.broadcast %cst_83 : f32 to vector<128xf32>
    %178 = arith.select %168, %177, %176 : vector<128xi1>, vector<128xf32>
    %cst_84 = arith.constant 0.949999988 : f32
    %179 = vector.broadcast %cst_84 : f32 to vector<128xf32>
    %180 = arith.mulf %118, %179 : vector<128xf32>
    %cst_85 = arith.constant 1.000000e+00 : f32
    %181 = vector.broadcast %cst_85 : f32 to vector<128xf32>
    %182 = arith.mulf %181, %154 : vector<128xf32>
    %183 = arith.addf %180, %182 : vector<128xf32>
    %cst_86 = arith.constant 8.000000e-01 : f32
    %184 = vector.broadcast %cst_86 : f32 to vector<128xf32>
    %185 = arith.mulf %125, %184 : vector<128xf32>
    %cst_87 = arith.constant 1.000000e+00 : f32
    %186 = vector.broadcast %cst_87 : f32 to vector<128xf32>
    %187 = arith.mulf %186, %183 : vector<128xf32>
    %cst_88 = arith.constant 0.000000e+00 : f32
    %188 = vector.broadcast %cst_88 : f32 to vector<128xf32>
    %189 = arith.select %168, %187, %188 : vector<128xi1>, vector<128xf32>
    %190 = arith.addf %185, %189 : vector<128xf32>
    %cst_89 = arith.constant 0.899999976 : f32
    %191 = vector.broadcast %cst_89 : f32 to vector<128xf32>
    %192 = arith.mulf %142, %191 : vector<128xf32>
    %cst_90 = arith.constant 1.000000e+00 : f32
    %193 = vector.broadcast %cst_90 : f32 to vector<128xf32>
    %194 = arith.mulf %190, %193 : vector<128xf32>
    %195 = arith.addf %192, %194 : vector<128xf32>
    %cst_91 = arith.constant 8.000000e-01 : f32
    %196 = vector.broadcast %cst_91 : f32 to vector<128xf32>
    %197 = arith.cmpf ogt, %195, %196 : vector<128xf32>
    %cst_92 = arith.constant 1.000000e+00 : f32
    %198 = vector.broadcast %cst_92 : f32 to vector<128xf32>
    %199 = arith.subf %136, %198 : vector<128xf32>
    %cst_93 = arith.constant 2.000000e+00 : f32
    %200 = vector.broadcast %cst_93 : f32 to vector<128xf32>
    %201 = arith.select %197, %200, %199 : vector<128xi1>, vector<128xf32>
    %cst_94 = arith.constant 0.000000e+00 : f32
    %202 = vector.broadcast %cst_94 : f32 to vector<128xf32>
    %203 = arith.cmpf ole, %201, %202 : vector<128xf32>
    %cst_95 = arith.constant 0.000000e+00 : f32
    %204 = vector.broadcast %cst_95 : f32 to vector<128xf32>
    %205 = arith.select %203, %195, %204 : vector<128xi1>, vector<128xf32>
    %cst_96 = arith.constant 0.000000e+00 : f32
    %206 = vector.broadcast %cst_96 : f32 to vector<128xf32>
    %207 = arith.select %197, %206, %205 : vector<128xi1>, vector<128xf32>
    %208 = arith.extui %168 : vector<128xi1> to vector<128xi32>
    %209 = arith.sitofp %208 : vector<128xi32> to vector<128xf32>
    %c2_97 = arith.constant 2 : index
    %c0_98 = arith.constant 0 : index
    %210 = vector.load %arg6[%c2_97, %c0_98] : memref<8x128xf32, #tpu.memory_space<vmem>>, vector<1x128xf32>
    %211 = vector.shape_cast %210 : vector<1x128xf32> to vector<128xf32>
    %212 = vector.shape_cast %209 : vector<128xf32> to vector<1x128xf32>
    tpu.vector_store %arg6[%c2_97, %c0_98], %212 {strides = array<i32>} : memref<8x128xf32, #tpu.memory_space<vmem>>, vector<1x128xf32>,
    %213 = arith.extui %197 : vector<128xi1> to vector<128xi32>
    %214 = arith.sitofp %213 : vector<128xi32> to vector<128xf32>
    %c2_99 = arith.constant 2 : index
    %c0_100 = arith.constant 0 : index
    %215 = vector.load %arg5[%c2_99, %c0_100] : memref<8x128xf32, #tpu.memory_space<vmem>>, vector<1x128xf32>
    %216 = vector.shape_cast %215 : vector<1x128xf32> to vector<128xf32>
    %217 = vector.shape_cast %214 : vector<128xf32> to vector<1x128xf32>
    tpu.vector_store %arg5[%c2_99, %c0_100], %217 {strides = array<i32>} : memref<8x128xf32, #tpu.memory_space<vmem>>, vector<1x128xf32>,
    %c3_101 = arith.constant 3 : index
    %c0_102 = arith.constant 0 : index
    %218 = vector.load %arg3[%c3_101, %c0_102] : memref<8x128xf32, #tpu.memory_space<vmem>>, vector<1x128xf32>
    %219 = vector.shape_cast %218 : vector<1x128xf32> to vector<128xf32>
    %cst_103 = arith.constant 8.000000e-01 : f32
    %220 = vector.broadcast %cst_103 : f32 to vector<128xf32>
    %221 = arith.mulf %160, %220 : vector<128xf32>
    %cst_104 = arith.constant 1.000000e+00 : f32
    %cst_105 = arith.constant 0.000000e+00 : f32
    %222 = vector.broadcast %cst_104 : f32 to vector<128xf32>
    %223 = vector.broadcast %cst_105 : f32 to vector<128xf32>
    %224 = arith.select %197, %222, %223 : vector<128xi1>, vector<128xf32>
    %225 = arith.addf %221, %224 : vector<128xf32>
    %cst_106 = arith.constant 0.899999976 : f32
    %226 = vector.broadcast %cst_106 : f32 to vector<128xf32>
    %227 = arith.mulf %178, %226 : vector<128xf32>
    %228 = arith.addf %225, %4 : vector<128xf32>
    %cst_107 = arith.constant 1.000000e+00 : f32
    %229 = vector.broadcast %cst_107 : f32 to vector<128xf32>
    %230 = arith.mulf %228, %229 : vector<128xf32>
    %231 = arith.addf %227, %230 : vector<128xf32>
    %cst_108 = arith.constant 1.500000e+00 : f32
    %232 = vector.broadcast %cst_108 : f32 to vector<128xf32>
    %233 = arith.cmpf ogt, %231, %232 : vector<128xf32>
    %cst_109 = arith.constant 1.000000e+00 : f32
    %234 = vector.broadcast %cst_109 : f32 to vector<128xf32>
    %235 = arith.subf %172, %234 : vector<128xf32>
    %cst_110 = arith.constant 3.000000e+00 : f32
    %236 = vector.broadcast %cst_110 : f32 to vector<128xf32>
    %237 = arith.select %233, %236, %235 : vector<128xi1>, vector<128xf32>
    %cst_111 = arith.constant 0.000000e+00 : f32
    %238 = vector.broadcast %cst_111 : f32 to vector<128xf32>
    %239 = arith.cmpf ole, %237, %238 : vector<128xf32>
    %cst_112 = arith.constant 0.000000e+00 : f32
    %240 = vector.broadcast %cst_112 : f32 to vector<128xf32>
    %241 = arith.select %239, %231, %240 : vector<128xi1>, vector<128xf32>
    %cst_113 = arith.constant 0.000000e+00 : f32
    %242 = vector.broadcast %cst_113 : f32 to vector<128xf32>
    %243 = arith.select %233, %242, %241 : vector<128xi1>, vector<128xf32>
    %cst_114 = arith.constant 0.949999988 : f32
    %244 = vector.broadcast %cst_114 : f32 to vector<128xf32>
    %245 = arith.mulf %183, %244 : vector<128xf32>
    %cst_115 = arith.constant 1.000000e+00 : f32
    %246 = vector.broadcast %cst_115 : f32 to vector<128xf32>
    %247 = arith.mulf %246, %219 : vector<128xf32>
    %248 = arith.addf %245, %247 : vector<128xf32>
    %cst_116 = arith.constant 8.000000e-01 : f32
    %249 = vector.broadcast %cst_116 : f32 to vector<128xf32>
    %250 = arith.mulf %190, %249 : vector<128xf32>
    %cst_117 = arith.constant 1.000000e+00 : f32
    %251 = vector.broadcast %cst_117 : f32 to vector<128xf32>
    %252 = arith.mulf %251, %248 : vector<128xf32>
    %cst_118 = arith.constant 0.000000e+00 : f32
    %253 = vector.broadcast %cst_118 : f32 to vector<128xf32>
    %254 = arith.select %233, %252, %253 : vector<128xi1>, vector<128xf32>
    %255 = arith.addf %250, %254 : vector<128xf32>
    %cst_119 = arith.constant 0.899999976 : f32
    %256 = vector.broadcast %cst_119 : f32 to vector<128xf32>
    %257 = arith.mulf %207, %256 : vector<128xf32>
    %cst_120 = arith.constant 1.000000e+00 : f32
    %258 = vector.broadcast %cst_120 : f32 to vector<128xf32>
    %259 = arith.mulf %255, %258 : vector<128xf32>
    %260 = arith.addf %257, %259 : vector<128xf32>
    %cst_121 = arith.constant 8.000000e-01 : f32
    %261 = vector.broadcast %cst_121 : f32 to vector<128xf32>
    %262 = arith.cmpf ogt, %260, %261 : vector<128xf32>
    %cst_122 = arith.constant 1.000000e+00 : f32
    %263 = vector.broadcast %cst_122 : f32 to vector<128xf32>
    %264 = arith.subf %201, %263 : vector<128xf32>
    %cst_123 = arith.constant 2.000000e+00 : f32
    %265 = vector.broadcast %cst_123 : f32 to vector<128xf32>
    %266 = arith.select %262, %265, %264 : vector<128xi1>, vector<128xf32>
    %cst_124 = arith.constant 0.000000e+00 : f32
    %267 = vector.broadcast %cst_124 : f32 to vector<128xf32>
    %268 = arith.cmpf ole, %266, %267 : vector<128xf32>
    %cst_125 = arith.constant 0.000000e+00 : f32
    %269 = vector.broadcast %cst_125 : f32 to vector<128xf32>
    %270 = arith.select %268, %260, %269 : vector<128xi1>, vector<128xf32>
    %cst_126 = arith.constant 0.000000e+00 : f32
    %271 = vector.broadcast %cst_126 : f32 to vector<128xf32>
    %272 = arith.select %262, %271, %270 : vector<128xi1>, vector<128xf32>
    %273 = arith.extui %233 : vector<128xi1> to vector<128xi32>
    %274 = arith.sitofp %273 : vector<128xi32> to vector<128xf32>
    %c3_127 = arith.constant 3 : index
    %c0_128 = arith.constant 0 : index
    %275 = vector.load %arg6[%c3_127, %c0_128] : memref<8x128xf32, #tpu.memory_space<vmem>>, vector<1x128xf32>
    %276 = vector.shape_cast %275 : vector<1x128xf32> to vector<128xf32>
    %277 = vector.shape_cast %274 : vector<128xf32> to vector<1x128xf32>
    tpu.vector_store %arg6[%c3_127, %c0_128], %277 {strides = array<i32>} : memref<8x128xf32, #tpu.memory_space<vmem>>, vector<1x128xf32>,
    %278 = arith.extui %262 : vector<128xi1> to vector<128xi32>
    %279 = arith.sitofp %278 : vector<128xi32> to vector<128xf32>
    %c3_129 = arith.constant 3 : index
    %c0_130 = arith.constant 0 : index
    %280 = vector.load %arg5[%c3_129, %c0_130] : memref<8x128xf32, #tpu.memory_space<vmem>>, vector<1x128xf32>
    %281 = vector.shape_cast %280 : vector<1x128xf32> to vector<128xf32>
    %282 = vector.shape_cast %279 : vector<128xf32> to vector<1x128xf32>
    tpu.vector_store %arg5[%c3_129, %c0_130], %282 {strides = array<i32>} : memref<8x128xf32, #tpu.memory_space<vmem>>, vector<1x128xf32>,
    %c4_131 = arith.constant 4 : index
    %c0_132 = arith.constant 0 : index
    %283 = vector.load %arg3[%c4_131, %c0_132] : memref<8x128xf32, #tpu.memory_space<vmem>>, vector<1x128xf32>
    %284 = vector.shape_cast %283 : vector<1x128xf32> to vector<128xf32>
    %cst_133 = arith.constant 8.000000e-01 : f32
    %285 = vector.broadcast %cst_133 : f32 to vector<128xf32>
    %286 = arith.mulf %225, %285 : vector<128xf32>
    %cst_134 = arith.constant 1.000000e+00 : f32
    %cst_135 = arith.constant 0.000000e+00 : f32
    %287 = vector.broadcast %cst_134 : f32 to vector<128xf32>
    %288 = vector.broadcast %cst_135 : f32 to vector<128xf32>
    %289 = arith.select %262, %287, %288 : vector<128xi1>, vector<128xf32>
    %290 = arith.addf %286, %289 : vector<128xf32>
    %cst_136 = arith.constant 0.899999976 : f32
    %291 = vector.broadcast %cst_136 : f32 to vector<128xf32>
    %292 = arith.mulf %243, %291 : vector<128xf32>
    %293 = arith.addf %290, %4 : vector<128xf32>
    %cst_137 = arith.constant 1.000000e+00 : f32
    %294 = vector.broadcast %cst_137 : f32 to vector<128xf32>
    %295 = arith.mulf %293, %294 : vector<128xf32>
    %296 = arith.addf %292, %295 : vector<128xf32>
    %cst_138 = arith.constant 1.500000e+00 : f32
    %297 = vector.broadcast %cst_138 : f32 to vector<128xf32>
    %298 = arith.cmpf ogt, %296, %297 : vector<128xf32>
    %cst_139 = arith.constant 1.000000e+00 : f32
    %299 = vector.broadcast %cst_139 : f32 to vector<128xf32>
    %300 = arith.subf %237, %299 : vector<128xf32>
    %cst_140 = arith.constant 3.000000e+00 : f32
    %301 = vector.broadcast %cst_140 : f32 to vector<128xf32>
    %302 = arith.select %298, %301, %300 : vector<128xi1>, vector<128xf32>
    %cst_141 = arith.constant 0.000000e+00 : f32
    %303 = vector.broadcast %cst_141 : f32 to vector<128xf32>
    %304 = arith.cmpf ole, %302, %303 : vector<128xf32>
    %cst_142 = arith.constant 0.000000e+00 : f32
    %305 = vector.broadcast %cst_142 : f32 to vector<128xf32>
    %306 = arith.select %304, %296, %305 : vector<128xi1>, vector<128xf32>
    %cst_143 = arith.constant 0.000000e+00 : f32
    %307 = vector.broadcast %cst_143 : f32 to vector<128xf32>
    %308 = arith.select %298, %307, %306 : vector<128xi1>, vector<128xf32>
    %cst_144 = arith.constant 0.949999988 : f32
    %309 = vector.broadcast %cst_144 : f32 to vector<128xf32>
    %310 = arith.mulf %248, %309 : vector<128xf32>
    %cst_145 = arith.constant 1.000000e+00 : f32
    %311 = vector.broadcast %cst_145 : f32 to vector<128xf32>
    %312 = arith.mulf %311, %284 : vector<128xf32>
    %313 = arith.addf %310, %312 : vector<128xf32>
    %cst_146 = arith.constant 8.000000e-01 : f32
    %314 = vector.broadcast %cst_146 : f32 to vector<128xf32>
    %315 = arith.mulf %255, %314 : vector<128xf32>
    %cst_147 = arith.constant 1.000000e+00 : f32
    %316 = vector.broadcast %cst_147 : f32 to vector<128xf32>
    %317 = arith.mulf %316, %313 : vector<128xf32>
    %cst_148 = arith.constant 0.000000e+00 : f32
    %318 = vector.broadcast %cst_148 : f32 to vector<128xf32>
    %319 = arith.select %298, %317, %318 : vector<128xi1>, vector<128xf32>
    %320 = arith.addf %315, %319 : vector<128xf32>
    %cst_149 = arith.constant 0.899999976 : f32
    %321 = vector.broadcast %cst_149 : f32 to vector<128xf32>
    %322 = arith.mulf %272, %321 : vector<128xf32>
    %cst_150 = arith.constant 1.000000e+00 : f32
    %323 = vector.broadcast %cst_150 : f32 to vector<128xf32>
    %324 = arith.mulf %320, %323 : vector<128xf32>
    %325 = arith.addf %322, %324 : vector<128xf32>
    %cst_151 = arith.constant 8.000000e-01 : f32
    %326 = vector.broadcast %cst_151 : f32 to vector<128xf32>
    %327 = arith.cmpf ogt, %325, %326 : vector<128xf32>
    %cst_152 = arith.constant 1.000000e+00 : f32
    %328 = vector.broadcast %cst_152 : f32 to vector<128xf32>
    %329 = arith.subf %266, %328 : vector<128xf32>
    %cst_153 = arith.constant 2.000000e+00 : f32
    %330 = vector.broadcast %cst_153 : f32 to vector<128xf32>
    %331 = arith.select %327, %330, %329 : vector<128xi1>, vector<128xf32>
    %cst_154 = arith.constant 0.000000e+00 : f32
    %332 = vector.broadcast %cst_154 : f32 to vector<128xf32>
    %333 = arith.cmpf ole, %331, %332 : vector<128xf32>
    %cst_155 = arith.constant 0.000000e+00 : f32
    %334 = vector.broadcast %cst_155 : f32 to vector<128xf32>
    %335 = arith.select %333, %325, %334 : vector<128xi1>, vector<128xf32>
    %cst_156 = arith.constant 0.000000e+00 : f32
    %336 = vector.broadcast %cst_156 : f32 to vector<128xf32>
    %337 = arith.select %327, %336, %335 : vector<128xi1>, vector<128xf32>
    %338 = arith.extui %298 : vector<128xi1> to vector<128xi32>
    %339 = arith.sitofp %338 : vector<128xi32> to vector<128xf32>
    %c4_157 = arith.constant 4 : index
    %c0_158 = arith.constant 0 : index
    %340 = vector.load %arg6[%c4_157, %c0_158] : memref<8x128xf32, #tpu.memory_space<vmem>>, vector<1x128xf32>
    %341 = vector.shape_cast %340 : vector<1x128xf32> to vector<128xf32>
    %342 = vector.shape_cast %339 : vector<128xf32> to vector<1x128xf32>
    tpu.vector_store %arg6[%c4_157, %c0_158], %342 {strides = array<i32>} : memref<8x128xf32, #tpu.memory_space<vmem>>, vector<1x128xf32>,
    %343 = arith.extui %327 : vector<128xi1> to vector<128xi32>
    %344 = arith.sitofp %343 : vector<128xi32> to vector<128xf32>
    %c4_159 = arith.constant 4 : index
    %c0_160 = arith.constant 0 : index
    %345 = vector.load %arg5[%c4_159, %c0_160] : memref<8x128xf32, #tpu.memory_space<vmem>>, vector<1x128xf32>
    %346 = vector.shape_cast %345 : vector<1x128xf32> to vector<128xf32>
    %347 = vector.shape_cast %344 : vector<128xf32> to vector<1x128xf32>
    tpu.vector_store %arg5[%c4_159, %c0_160], %347 {strides = array<i32>} : memref<8x128xf32, #tpu.memory_space<vmem>>, vector<1x128xf32>,
    %c5_161 = arith.constant 5 : index
    %c0_162 = arith.constant 0 : index
    %348 = vector.load %arg3[%c5_161, %c0_162] : memref<8x128xf32, #tpu.memory_space<vmem>>, vector<1x128xf32>
    %349 = vector.shape_cast %348 : vector<1x128xf32> to vector<128xf32>
    %cst_163 = arith.constant 8.000000e-01 : f32
    %350 = vector.broadcast %cst_163 : f32 to vector<128xf32>
    %351 = arith.mulf %290, %350 : vector<128xf32>
    %cst_164 = arith.constant 1.000000e+00 : f32
    %cst_165 = arith.constant 0.000000e+00 : f32
    %352 = vector.broadcast %cst_164 : f32 to vector<128xf32>
    %353 = vector.broadcast %cst_165 : f32 to vector<128xf32>
    %354 = arith.select %327, %352, %353 : vector<128xi1>, vector<128xf32>
    %355 = arith.addf %351, %354 : vector<128xf32>
    %cst_166 = arith.constant 0.899999976 : f32
    %356 = vector.broadcast %cst_166 : f32 to vector<128xf32>
    %357 = arith.mulf %308, %356 : vector<128xf32>
    %358 = arith.addf %355, %4 : vector<128xf32>
    %cst_167 = arith.constant 1.000000e+00 : f32
    %359 = vector.broadcast %cst_167 : f32 to vector<128xf32>
    %360 = arith.mulf %358, %359 : vector<128xf32>
    %361 = arith.addf %357, %360 : vector<128xf32>
    %cst_168 = arith.constant 1.500000e+00 : f32
    %362 = vector.broadcast %cst_168 : f32 to vector<128xf32>
    %363 = arith.cmpf ogt, %361, %362 : vector<128xf32>
    %cst_169 = arith.constant 1.000000e+00 : f32
    %364 = vector.broadcast %cst_169 : f32 to vector<128xf32>
    %365 = arith.subf %302, %364 : vector<128xf32>
    %cst_170 = arith.constant 3.000000e+00 : f32
    %366 = vector.broadcast %cst_170 : f32 to vector<128xf32>
    %367 = arith.select %363, %366, %365 : vector<128xi1>, vector<128xf32>
    %cst_171 = arith.constant 0.000000e+00 : f32
    %368 = vector.broadcast %cst_171 : f32 to vector<128xf32>
    %369 = arith.cmpf ole, %367, %368 : vector<128xf32>
    %cst_172 = arith.constant 0.000000e+00 : f32
    %370 = vector.broadcast %cst_172 : f32 to vector<128xf32>
    %371 = arith.select %369, %361, %370 : vector<128xi1>, vector<128xf32>
    %cst_173 = arith.constant 0.000000e+00 : f32
    %372 = vector.broadcast %cst_173 : f32 to vector<128xf32>
    %373 = arith.select %363, %372, %371 : vector<128xi1>, vector<128xf32>
    %cst_174 = arith.constant 0.949999988 : f32
    %374 = vector.broadcast %cst_174 : f32 to vector<128xf32>
    %375 = arith.mulf %313, %374 : vector<128xf32>
    %cst_175 = arith.constant 1.000000e+00 : f32
    %376 = vector.broadcast %cst_175 : f32 to vector<128xf32>
    %377 = arith.mulf %376, %349 : vector<128xf32>
    %378 = arith.addf %375, %377 : vector<128xf32>
    %cst_176 = arith.constant 8.000000e-01 : f32
    %379 = vector.broadcast %cst_176 : f32 to vector<128xf32>
    %380 = arith.mulf %320, %379 : vector<128xf32>
    %cst_177 = arith.constant 1.000000e+00 : f32
    %381 = vector.broadcast %cst_177 : f32 to vector<128xf32>
    %382 = arith.mulf %381, %378 : vector<128xf32>
    %cst_178 = arith.constant 0.000000e+00 : f32
    %383 = vector.broadcast %cst_178 : f32 to vector<128xf32>
    %384 = arith.select %363, %382, %383 : vector<128xi1>, vector<128xf32>
    %385 = arith.addf %380, %384 : vector<128xf32>
    %cst_179 = arith.constant 0.899999976 : f32
    %386 = vector.broadcast %cst_179 : f32 to vector<128xf32>
    %387 = arith.mulf %337, %386 : vector<128xf32>
    %cst_180 = arith.constant 1.000000e+00 : f32
    %388 = vector.broadcast %cst_180 : f32 to vector<128xf32>
    %389 = arith.mulf %385, %388 : vector<128xf32>
    %390 = arith.addf %387, %389 : vector<128xf32>
    %cst_181 = arith.constant 8.000000e-01 : f32
    %391 = vector.broadcast %cst_181 : f32 to vector<128xf32>
    %392 = arith.cmpf ogt, %390, %391 : vector<128xf32>
    %cst_182 = arith.constant 1.000000e+00 : f32
    %393 = vector.broadcast %cst_182 : f32 to vector<128xf32>
    %394 = arith.subf %331, %393 : vector<128xf32>
    %cst_183 = arith.constant 2.000000e+00 : f32
    %395 = vector.broadcast %cst_183 : f32 to vector<128xf32>
    %396 = arith.select %392, %395, %394 : vector<128xi1>, vector<128xf32>
    %cst_184 = arith.constant 0.000000e+00 : f32
    %397 = vector.broadcast %cst_184 : f32 to vector<128xf32>
    %398 = arith.cmpf ole, %396, %397 : vector<128xf32>
    %cst_185 = arith.constant 0.000000e+00 : f32
    %399 = vector.broadcast %cst_185 : f32 to vector<128xf32>
    %400 = arith.select %398, %390, %399 : vector<128xi1>, vector<128xf32>
    %cst_186 = arith.constant 0.000000e+00 : f32
    %401 = vector.broadcast %cst_186 : f32 to vector<128xf32>
    %402 = arith.select %392, %401, %400 : vector<128xi1>, vector<128xf32>
    %403 = arith.extui %363 : vector<128xi1> to vector<128xi32>
    %404 = arith.sitofp %403 : vector<128xi32> to vector<128xf32>
    %c5_187 = arith.constant 5 : index
    %c0_188 = arith.constant 0 : index
    %405 = vector.load %arg6[%c5_187, %c0_188] : memref<8x128xf32, #tpu.memory_space<vmem>>, vector<1x128xf32>
    %406 = vector.shape_cast %405 : vector<1x128xf32> to vector<128xf32>
    %407 = vector.shape_cast %404 : vector<128xf32> to vector<1x128xf32>
    tpu.vector_store %arg6[%c5_187, %c0_188], %407 {strides = array<i32>} : memref<8x128xf32, #tpu.memory_space<vmem>>, vector<1x128xf32>,
    %408 = arith.extui %392 : vector<128xi1> to vector<128xi32>
    %409 = arith.sitofp %408 : vector<128xi32> to vector<128xf32>
    %c5_189 = arith.constant 5 : index
    %c0_190 = arith.constant 0 : index
    %410 = vector.load %arg5[%c5_189, %c0_190] : memref<8x128xf32, #tpu.memory_space<vmem>>, vector<1x128xf32>
    %411 = vector.shape_cast %410 : vector<1x128xf32> to vector<128xf32>
    %412 = vector.shape_cast %409 : vector<128xf32> to vector<1x128xf32>
    tpu.vector_store %arg5[%c5_189, %c0_190], %412 {strides = array<i32>} : memref<8x128xf32, #tpu.memory_space<vmem>>, vector<1x128xf32>,
    %c6_191 = arith.constant 6 : index
    %c0_192 = arith.constant 0 : index
    %413 = vector.load %arg3[%c6_191, %c0_192] : memref<8x128xf32, #tpu.memory_space<vmem>>, vector<1x128xf32>
    %414 = vector.shape_cast %413 : vector<1x128xf32> to vector<128xf32>
    %cst_193 = arith.constant 8.000000e-01 : f32
    %415 = vector.broadcast %cst_193 : f32 to vector<128xf32>
    %416 = arith.mulf %355, %415 : vector<128xf32>
    %cst_194 = arith.constant 1.000000e+00 : f32
    %cst_195 = arith.constant 0.000000e+00 : f32
    %417 = vector.broadcast %cst_194 : f32 to vector<128xf32>
    %418 = vector.broadcast %cst_195 : f32 to vector<128xf32>
    %419 = arith.select %392, %417, %418 : vector<128xi1>, vector<128xf32>
    %420 = arith.addf %416, %419 : vector<128xf32>
    %cst_196 = arith.constant 0.899999976 : f32
    %421 = vector.broadcast %cst_196 : f32 to vector<128xf32>
    %422 = arith.mulf %373, %421 : vector<128xf32>
    %423 = arith.addf %420, %4 : vector<128xf32>
    %cst_197 = arith.constant 1.000000e+00 : f32
    %424 = vector.broadcast %cst_197 : f32 to vector<128xf32>
    %425 = arith.mulf %423, %424 : vector<128xf32>
    %426 = arith.addf %422, %425 : vector<128xf32>
    %cst_198 = arith.constant 1.500000e+00 : f32
    %427 = vector.broadcast %cst_198 : f32 to vector<128xf32>
    %428 = arith.cmpf ogt, %426, %427 : vector<128xf32>
    %cst_199 = arith.constant 1.000000e+00 : f32
    %429 = vector.broadcast %cst_199 : f32 to vector<128xf32>
    %430 = arith.subf %367, %429 : vector<128xf32>
    %cst_200 = arith.constant 3.000000e+00 : f32
    %431 = vector.broadcast %cst_200 : f32 to vector<128xf32>
    %432 = arith.select %428, %431, %430 : vector<128xi1>, vector<128xf32>
    %cst_201 = arith.constant 0.000000e+00 : f32
    %433 = vector.broadcast %cst_201 : f32 to vector<128xf32>
    %434 = arith.cmpf ole, %432, %433 : vector<128xf32>
    %cst_202 = arith.constant 0.000000e+00 : f32
    %435 = vector.broadcast %cst_202 : f32 to vector<128xf32>
    %436 = arith.select %434, %426, %435 : vector<128xi1>, vector<128xf32>
    %cst_203 = arith.constant 0.000000e+00 : f32
    %437 = vector.broadcast %cst_203 : f32 to vector<128xf32>
    %438 = arith.select %428, %437, %436 : vector<128xi1>, vector<128xf32>
    %cst_204 = arith.constant 0.949999988 : f32
    %439 = vector.broadcast %cst_204 : f32 to vector<128xf32>
    %440 = arith.mulf %378, %439 : vector<128xf32>
    %cst_205 = arith.constant 1.000000e+00 : f32
    %441 = vector.broadcast %cst_205 : f32 to vector<128xf32>
    %442 = arith.mulf %441, %414 : vector<128xf32>
    %443 = arith.addf %440, %442 : vector<128xf32>
    %cst_206 = arith.constant 8.000000e-01 : f32
    %444 = vector.broadcast %cst_206 : f32 to vector<128xf32>
    %445 = arith.mulf %385, %444 : vector<128xf32>
    %cst_207 = arith.constant 1.000000e+00 : f32
    %446 = vector.broadcast %cst_207 : f32 to vector<128xf32>
    %447 = arith.mulf %446, %443 : vector<128xf32>
    %cst_208 = arith.constant 0.000000e+00 : f32
    %448 = vector.broadcast %cst_208 : f32 to vector<128xf32>
    %449 = arith.select %428, %447, %448 : vector<128xi1>, vector<128xf32>
    %450 = arith.addf %445, %449 : vector<128xf32>
    %cst_209 = arith.constant 0.899999976 : f32
    %451 = vector.broadcast %cst_209 : f32 to vector<128xf32>
    %452 = arith.mulf %402, %451 : vector<128xf32>
    %cst_210 = arith.constant 1.000000e+00 : f32
    %453 = vector.broadcast %cst_210 : f32 to vector<128xf32>
    %454 = arith.mulf %450, %453 : vector<128xf32>
    %455 = arith.addf %452, %454 : vector<128xf32>
    %cst_211 = arith.constant 8.000000e-01 : f32
    %456 = vector.broadcast %cst_211 : f32 to vector<128xf32>
    %457 = arith.cmpf ogt, %455, %456 : vector<128xf32>
    %cst_212 = arith.constant 1.000000e+00 : f32
    %458 = vector.broadcast %cst_212 : f32 to vector<128xf32>
    %459 = arith.subf %396, %458 : vector<128xf32>
    %cst_213 = arith.constant 2.000000e+00 : f32
    %460 = vector.broadcast %cst_213 : f32 to vector<128xf32>
    %461 = arith.select %457, %460, %459 : vector<128xi1>, vector<128xf32>
    %cst_214 = arith.constant 0.000000e+00 : f32
    %462 = vector.broadcast %cst_214 : f32 to vector<128xf32>
    %463 = arith.cmpf ole, %461, %462 : vector<128xf32>
    %cst_215 = arith.constant 0.000000e+00 : f32
    %464 = vector.broadcast %cst_215 : f32 to vector<128xf32>
    %465 = arith.select %463, %455, %464 : vector<128xi1>, vector<128xf32>
    %cst_216 = arith.constant 0.000000e+00 : f32
    %466 = vector.broadcast %cst_216 : f32 to vector<128xf32>
    %467 = arith.select %457, %466, %465 : vector<128xi1>, vector<128xf32>
    %468 = arith.extui %428 : vector<128xi1> to vector<128xi32>
    %469 = arith.sitofp %468 : vector<128xi32> to vector<128xf32>
    %c6_217 = arith.constant 6 : index
    %c0_218 = arith.constant 0 : index
    %470 = vector.load %arg6[%c6_217, %c0_218] : memref<8x128xf32, #tpu.memory_space<vmem>>, vector<1x128xf32>
    %471 = vector.shape_cast %470 : vector<1x128xf32> to vector<128xf32>
    %472 = vector.shape_cast %469 : vector<128xf32> to vector<1x128xf32>
    tpu.vector_store %arg6[%c6_217, %c0_218], %472 {strides = array<i32>} : memref<8x128xf32, #tpu.memory_space<vmem>>, vector<1x128xf32>,
    %473 = arith.extui %457 : vector<128xi1> to vector<128xi32>
    %474 = arith.sitofp %473 : vector<128xi32> to vector<128xf32>
    %c6_219 = arith.constant 6 : index
    %c0_220 = arith.constant 0 : index
    %475 = vector.load %arg5[%c6_219, %c0_220] : memref<8x128xf32, #tpu.memory_space<vmem>>, vector<1x128xf32>
    %476 = vector.shape_cast %475 : vector<1x128xf32> to vector<128xf32>
    %477 = vector.shape_cast %474 : vector<128xf32> to vector<1x128xf32>
    tpu.vector_store %arg5[%c6_219, %c0_220], %477 {strides = array<i32>} : memref<8x128xf32, #tpu.memory_space<vmem>>, vector<1x128xf32>,
    %c7_221 = arith.constant 7 : index
    %c0_222 = arith.constant 0 : index
    %478 = vector.load %arg3[%c7_221, %c0_222] : memref<8x128xf32, #tpu.memory_space<vmem>>, vector<1x128xf32>
    %479 = vector.shape_cast %478 : vector<1x128xf32> to vector<128xf32>
    %cst_223 = arith.constant 8.000000e-01 : f32
    %480 = vector.broadcast %cst_223 : f32 to vector<128xf32>
    %481 = arith.mulf %420, %480 : vector<128xf32>
    %cst_224 = arith.constant 1.000000e+00 : f32
    %cst_225 = arith.constant 0.000000e+00 : f32
    %482 = vector.broadcast %cst_224 : f32 to vector<128xf32>
    %483 = vector.broadcast %cst_225 : f32 to vector<128xf32>
    %484 = arith.select %457, %482, %483 : vector<128xi1>, vector<128xf32>
    %485 = arith.addf %481, %484 : vector<128xf32>
    %cst_226 = arith.constant 0.899999976 : f32
    %486 = vector.broadcast %cst_226 : f32 to vector<128xf32>
    %487 = arith.mulf %438, %486 : vector<128xf32>
    %488 = arith.addf %485, %4 : vector<128xf32>
    %cst_227 = arith.constant 1.000000e+00 : f32
    %489 = vector.broadcast %cst_227 : f32 to vector<128xf32>
    %490 = arith.mulf %488, %489 : vector<128xf32>
    %491 = arith.addf %487, %490 : vector<128xf32>
    %cst_228 = arith.constant 1.500000e+00 : f32
    %492 = vector.broadcast %cst_228 : f32 to vector<128xf32>
    %493 = arith.cmpf ogt, %491, %492 : vector<128xf32>
    %cst_229 = arith.constant 1.000000e+00 : f32
    %494 = vector.broadcast %cst_229 : f32 to vector<128xf32>
    %495 = arith.subf %432, %494 : vector<128xf32>
    %cst_230 = arith.constant 3.000000e+00 : f32
    %496 = vector.broadcast %cst_230 : f32 to vector<128xf32>
    %497 = arith.select %493, %496, %495 : vector<128xi1>, vector<128xf32>
    %cst_231 = arith.constant 0.000000e+00 : f32
    %498 = vector.broadcast %cst_231 : f32 to vector<128xf32>
    %499 = arith.cmpf ole, %497, %498 : vector<128xf32>
    %cst_232 = arith.constant 0.000000e+00 : f32
    %500 = vector.broadcast %cst_232 : f32 to vector<128xf32>
    %501 = arith.select %499, %491, %500 : vector<128xi1>, vector<128xf32>
    %cst_233 = arith.constant 0.000000e+00 : f32
    %502 = vector.broadcast %cst_233 : f32 to vector<128xf32>
    %503 = arith.select %493, %502, %501 : vector<128xi1>, vector<128xf32>
    %cst_234 = arith.constant 0.949999988 : f32
    %504 = vector.broadcast %cst_234 : f32 to vector<128xf32>
    %505 = arith.mulf %443, %504 : vector<128xf32>
    %cst_235 = arith.constant 1.000000e+00 : f32
    %506 = vector.broadcast %cst_235 : f32 to vector<128xf32>
    %507 = arith.mulf %506, %479 : vector<128xf32>
    %508 = arith.addf %505, %507 : vector<128xf32>
    %cst_236 = arith.constant 8.000000e-01 : f32
    %509 = vector.broadcast %cst_236 : f32 to vector<128xf32>
    %510 = arith.mulf %450, %509 : vector<128xf32>
    %cst_237 = arith.constant 1.000000e+00 : f32
    %511 = vector.broadcast %cst_237 : f32 to vector<128xf32>
    %512 = arith.mulf %511, %508 : vector<128xf32>
    %cst_238 = arith.constant 0.000000e+00 : f32
    %513 = vector.broadcast %cst_238 : f32 to vector<128xf32>
    %514 = arith.select %493, %512, %513 : vector<128xi1>, vector<128xf32>
    %515 = arith.addf %510, %514 : vector<128xf32>
    %cst_239 = arith.constant 0.899999976 : f32
    %516 = vector.broadcast %cst_239 : f32 to vector<128xf32>
    %517 = arith.mulf %467, %516 : vector<128xf32>
    %cst_240 = arith.constant 1.000000e+00 : f32
    %518 = vector.broadcast %cst_240 : f32 to vector<128xf32>
    %519 = arith.mulf %515, %518 : vector<128xf32>
    %520 = arith.addf %517, %519 : vector<128xf32>
    %cst_241 = arith.constant 8.000000e-01 : f32
    %521 = vector.broadcast %cst_241 : f32 to vector<128xf32>
    %522 = arith.cmpf ogt, %520, %521 : vector<128xf32>
    %cst_242 = arith.constant 1.000000e+00 : f32
    %523 = vector.broadcast %cst_242 : f32 to vector<128xf32>
    %524 = arith.subf %461, %523 : vector<128xf32>
    %cst_243 = arith.constant 2.000000e+00 : f32
    %525 = vector.broadcast %cst_243 : f32 to vector<128xf32>
    %526 = arith.select %522, %525, %524 : vector<128xi1>, vector<128xf32>
    %cst_244 = arith.constant 0.000000e+00 : f32
    %527 = vector.broadcast %cst_244 : f32 to vector<128xf32>
    %528 = arith.cmpf ole, %526, %527 : vector<128xf32>
    %cst_245 = arith.constant 0.000000e+00 : f32
    %529 = vector.broadcast %cst_245 : f32 to vector<128xf32>
    %530 = arith.select %528, %520, %529 : vector<128xi1>, vector<128xf32>
    %cst_246 = arith.constant 0.000000e+00 : f32
    %531 = vector.broadcast %cst_246 : f32 to vector<128xf32>
    %532 = arith.select %522, %531, %530 : vector<128xi1>, vector<128xf32>
    %533 = arith.extui %493 : vector<128xi1> to vector<128xi32>
    %534 = arith.sitofp %533 : vector<128xi32> to vector<128xf32>
    %c7_247 = arith.constant 7 : index
    %c0_248 = arith.constant 0 : index
    %535 = vector.load %arg6[%c7_247, %c0_248] : memref<8x128xf32, #tpu.memory_space<vmem>>, vector<1x128xf32>
    %536 = vector.shape_cast %535 : vector<1x128xf32> to vector<128xf32>
    %537 = vector.shape_cast %534 : vector<128xf32> to vector<1x128xf32>
    tpu.vector_store %arg6[%c7_247, %c0_248], %537 {strides = array<i32>} : memref<8x128xf32, #tpu.memory_space<vmem>>, vector<1x128xf32>,
    %538 = arith.extui %522 : vector<128xi1> to vector<128xi32>
    %539 = arith.sitofp %538 : vector<128xi32> to vector<128xf32>
    %c7_249 = arith.constant 7 : index
    %c0_250 = arith.constant 0 : index
    %540 = vector.load %arg5[%c7_249, %c0_250] : memref<8x128xf32, #tpu.memory_space<vmem>>, vector<1x128xf32>
    %541 = vector.shape_cast %540 : vector<1x128xf32> to vector<128xf32>
    %542 = vector.shape_cast %539 : vector<128xf32> to vector<1x128xf32>
    tpu.vector_store %arg5[%c7_249, %c0_250], %542 {strides = array<i32>} : memref<8x128xf32, #tpu.memory_space<vmem>>, vector<1x128xf32>,
    %c0_251 = arith.constant 0 : index
    %c0_252 = arith.constant 0 : index
    %543 = vector.load %arg7[%c0_251, %c0_252] : memref<8x128xf32, #tpu.memory_space<vmem>>, vector<1x128xf32>
    %544 = vector.shape_cast %543 : vector<1x128xf32> to vector<128xf32>
    %545 = vector.shape_cast %503 : vector<128xf32> to vector<1x128xf32>
    tpu.vector_store %arg7[%c0_251, %c0_252], %545 {strides = array<i32>} : memref<8x128xf32, #tpu.memory_space<vmem>>, vector<1x128xf32>,
    %c1_253 = arith.constant 1 : index
    %c0_254 = arith.constant 0 : index
    %546 = vector.load %arg7[%c1_253, %c0_254] : memref<8x128xf32, #tpu.memory_space<vmem>>, vector<1x128xf32>
    %547 = vector.shape_cast %546 : vector<1x128xf32> to vector<128xf32>
    %548 = vector.shape_cast %485 : vector<128xf32> to vector<1x128xf32>
    tpu.vector_store %arg7[%c1_253, %c0_254], %548 {strides = array<i32>} : memref<8x128xf32, #tpu.memory_space<vmem>>, vector<1x128xf32>,
    %c2_255 = arith.constant 2 : index
    %c0_256 = arith.constant 0 : index
    %549 = vector.load %arg7[%c2_255, %c0_256] : memref<8x128xf32, #tpu.memory_space<vmem>>, vector<1x128xf32>
    %550 = vector.shape_cast %549 : vector<1x128xf32> to vector<128xf32>
    %551 = vector.shape_cast %497 : vector<128xf32> to vector<1x128xf32>
    tpu.vector_store %arg7[%c2_255, %c0_256], %551 {strides = array<i32>} : memref<8x128xf32, #tpu.memory_space<vmem>>, vector<1x128xf32>,
    %c3_257 = arith.constant 3 : index
    %c0_258 = arith.constant 0 : index
    %552 = vector.load %arg7[%c3_257, %c0_258] : memref<8x128xf32, #tpu.memory_space<vmem>>, vector<1x128xf32>
    %553 = vector.shape_cast %552 : vector<1x128xf32> to vector<128xf32>
    %554 = vector.shape_cast %532 : vector<128xf32> to vector<1x128xf32>
    tpu.vector_store %arg7[%c3_257, %c0_258], %554 {strides = array<i32>} : memref<8x128xf32, #tpu.memory_space<vmem>>, vector<1x128xf32>,
    %c4_259 = arith.constant 4 : index
    %c0_260 = arith.constant 0 : index
    %555 = vector.load %arg7[%c4_259, %c0_260] : memref<8x128xf32, #tpu.memory_space<vmem>>, vector<1x128xf32>
    %556 = vector.shape_cast %555 : vector<1x128xf32> to vector<128xf32>
    %557 = vector.shape_cast %515 : vector<128xf32> to vector<1x128xf32>
    tpu.vector_store %arg7[%c4_259, %c0_260], %557 {strides = array<i32>} : memref<8x128xf32, #tpu.memory_space<vmem>>, vector<1x128xf32>,
    %c5_261 = arith.constant 5 : index
    %c0_262 = arith.constant 0 : index
    %558 = vector.load %arg7[%c5_261, %c0_262] : memref<8x128xf32, #tpu.memory_space<vmem>>, vector<1x128xf32>
    %559 = vector.shape_cast %558 : vector<1x128xf32> to vector<128xf32>
    %560 = vector.shape_cast %508 : vector<128xf32> to vector<1x128xf32>
    tpu.vector_store %arg7[%c5_261, %c0_262], %560 {strides = array<i32>} : memref<8x128xf32, #tpu.memory_space<vmem>>, vector<1x128xf32>,
    %c6_263 = arith.constant 6 : index
    %c0_264 = arith.constant 0 : index
    %561 = vector.load %arg7[%c6_263, %c0_264] : memref<8x128xf32, #tpu.memory_space<vmem>>, vector<1x128xf32>
    %562 = vector.shape_cast %561 : vector<1x128xf32> to vector<128xf32>
    %563 = vector.shape_cast %526 : vector<128xf32> to vector<1x128xf32>
    tpu.vector_store %arg7[%c6_263, %c0_264], %563 {strides = array<i32>} : memref<8x128xf32, #tpu.memory_space<vmem>>, vector<1x128xf32>,
    %564 = arith.extui %522 : vector<128xi1> to vector<128xi32>
    %565 = arith.sitofp %564 : vector<128xi32> to vector<128xf32>
    %c7_265 = arith.constant 7 : index
    %c0_266 = arith.constant 0 : index
    %566 = vector.load %arg7[%c7_265, %c0_266] : memref<8x128xf32, #tpu.memory_space<vmem>>, vector<1x128xf32>
    %567 = vector.shape_cast %566 : vector<1x128xf32> to vector<128xf32>
    %568 = vector.shape_cast %565 : vector<128xf32> to vector<1x128xf32>
    tpu.vector_store %arg7[%c7_265, %c0_266], %568 {strides = array<i32>} : memref<8x128xf32, #tpu.memory_space<vmem>>, vector<1x128xf32>,
    return
  }
  func.func @transform_0(%arg0: i32, %arg1: i32) -> (i32, i32) {
    %c0_i32 = arith.constant 0 : i32
    %c0_i32_0 = arith.constant 0 : i32
    return %c0_i32, %arg0 : i32, i32
  }
  func.func @transform_1(%arg0: i32, %arg1: i32) -> (i32, i32) {
    %c0_i32 = arith.constant 0 : i32
    return %arg1, %arg0 : i32, i32
  }
  func.func @transform_2(%arg0: i32, %arg1: i32) -> (i32, i32) {
    %c0_i32 = arith.constant 0 : i32
    %c0_i32_0 = arith.constant 0 : i32
    return %c0_i32, %arg0 : i32, i32
  }
  func.func @transform_3(%arg0: i32, %arg1: i32) -> (i32, i32) {
    %c0_i32 = arith.constant 0 : i32
    return %arg1, %arg0 : i32, i32
  }
  func.func @transform_4(%arg0: i32, %arg1: i32) -> (i32, i32) {
    %c0_i32 = arith.constant 0 : i32
    return %arg1, %arg0 : i32, i32
  }
  func.func @transform_5(%arg0: i32, %arg1: i32) -> (i32, i32) {
    %c0_i32 = arith.constant 0 : i32
    %c0_i32_0 = arith.constant 0 : i32
    return %c0_i32, %arg0 : i32, i32
  }
}

</mosaic_0001>

<bundles_post_ra>
// kernel: tpu_custom_call.1
= control target key start
LH: loop header
LB: loop body
LE: loop exit
PB: predicated region body
PF: predicated region fallthrough
CT: control target
= control target key end

     0   :  { %s1427_s0 = inlined_call_operand.vmem [shape: f32[1,128], index: 0, kind: input, shape index: {}]   ;;  %s1428_s1 = inlined_call_operand.hbm [shape: f32[32,128], index: 1, kind: input, shape index: {}]   ;;  %s1429_s2 = inlined_call_operand.hbm [shape: f32[8,128], index: 2, kind: input, shape index: {}, may-alias: {2,5}]   ;;  %s1430_s3 = inlined_call_operand.hbm [shape: f32[32,128], index: 3, kind: output, shape index: {0}]   ;;  %s1431_s4 = inlined_call_operand.hbm [shape: f32[32,128], index: 4, kind: output, shape index: {1}]   ;;  %s1432_s5 = inlined_call_operand.hbm [shape: f32[8,128], index: 5, kind: output, shape index: {2}, may-alias: {2,5}]  }
   0x1   :  { %1434 = sst [smem:[#allocation16_spill]] %s1429_s2 }
   0x2   :  { %11 = vsyncpa [#allocation3], 0 }
   0x3   :  { %13 = vsyncpa [#allocation3 + $0x1], 0 }
   0x4   :  { %14 = vsyncpa [#allocation6], 0 }
   0x5   :  { %15 = vsyncpa [#allocation4], 0 }
   0x6   :  { %17 = vsyncpa [#allocation4 + $0x1], 0 }
   0x7   :  { %18 = vsyncpa [#allocation9], 0 }
   0x8   :  { %20 = vsyncpa [#allocation9 + $0x1], 0  ;;  %s1177_s18 = smov 0   ;;  %s1179_s19 = smov 0  }
   0x9   :  { %s1181_s20 = smov 0   ;;  %s1183_s21 = smov 0  }
   0xa   :  { %s1185_s22 = smov 0   ;;  %s1187_s23 = smov 0  }
   0xb LB: > { %s1208_s24 = sadd.s32 4294967295, %s1142_s23   ;;  %s1433_s25 = sadd.s32 4294967294, %s1142_s23   ;;  %s1142_s23 = sphi %s1187_s23, %s26_s23   ;;  %s1138_s22 = sphi %s1185_s22, %s1446_s22   ;;  %s1134_s21 = sphi %s1183_s21, %s1445_s21   ;;  %s1130_s20 = sphi %s1181_s20, %s1444_s20   ;;  %s1126_s19 = sphi %s1179_s19, %s1443_s19   ;;  %s1122_s18 = sphi %s1177_s18, %s1442_s18  }
   0xc   : > { %p86_p0 = scmp.ne.s32.totalorder %s1126_s19, %s1122_s18  ;;  %p87_p1 = scmp.eq.s32.totalorder %s1208_s24, 0 }
   0xd   : > { %p138_p2 = scmp.eq.s32.totalorder %s1208_s24, 3  ;;  %p144_p3 = scmp.eq.s32.totalorder %s1433_s25, 3 }
   0xe   : > { %p1219_p4 = por %p87_p1, %p86_p0  ;;  %p794_p5 = scmp.ge.s32.totalorder %s1142_s23, 1 }
   0xf   : > { %p1224_p6 = por %p144_p3, %p86_p0  ;;  %p205_p7 = scmp.lt.s32.totalorder %s1142_s23, 5 }
  0x10   : > { %s1437_s2 = sld [smem:[#allocation16_spill]]  ;;  %s1144_s7 = smov [#allocation5]  }
  0x11   : > { %p1232_p8 = pnand %p794_p5, %p205_p7  ;;  %s227_s8 = sshll.u32 %s1144_s7, 4  ;;  %s228_s8 = int_to_ptr.vmem [resolvable:$true] %s227_s8 }
  0x12   : > { %s35_s9 = sadd.s32 1, %s1138_s22  ;;  %s73_s10 = sadd.s32 1, %s1130_s20 }
  0x13   : > { %p860_p9 = pneg %p1232_p8  ;;  %p36_p11 = scmp.ge.s32.totalorder %s35_s9, 4 }
  0x14   : > { %p80_p12 = scmp.ne.s32.totalorder %s1130_s20, %s1126_s19  ;;  %p81_p13 = scmp.eq.s32.totalorder %s1142_s23, 0 }
  0x15   : > { %p861_p10 = pnand %p860_p9, %p87_p1  ;;  %s1448_s9 = smov (%p36_p11, %s35_s9), 0 }
  0x16   : > { %s225_s30 = sshll.u32 %s1437_s2, 4  ;;  %p1247_p0 = por %p81_p13, %p80_p12  ;;  %s226_s30 = int_to_ptr.hbm [resolvable:$true] %s225_s30 }
  0x17   : > { %863 = dma.hbm_to_vmem [thread:$0]  (!%p861_p10), %s226_s30, 128, %s228_s8, [#allocation6]  }
  0x18   : > { %p1253_p3 = por %p138_p2, %p80_p12  ;;  %s68_s13 = ssub.s32 %s1138_s22, %s1448_s9 }
  0x19   : > { %p876_p5 = scmp.lt.s32.totalorder %s1142_s23, 4  ;;  %p71_p7 = scmp.eq.s32.totalorder %s68_s13, 0 }
  0x1a   : > { %s238_s14 = sand.u32 1, %s1130_s20   ;;  %s799_s17 = sshll.u32 %s1138_s22, 3 }
  0x1b   : > { %s798_s15 = sshll.u32 %s238_s14, 3  ;;  %s247_s30 = scalar_lea.hbm %s1428_s1, %s799_s17 }
  0x1c   : > { %s1262_s16 = scalar_select %p71_p7, %s1130_s20, %s73_s10  }
  0x1d   : > { %s242_s7 = scalar_lea.vmem [#allocation2], %s798_s15  ;;  %s249_s25 = sshll.u32 %s247_s30, 4  ;;  %s250_s25 = int_to_ptr.hbm [resolvable:$true] %s249_s25 }
  0x1e   : > { %s251_s8 = sshll.u32 %s242_s7, 4  ;;  %p865_p9 = pnand %p876_p5, %p1247_p0  ;;  %s252_s8 = int_to_ptr.vmem [resolvable:$true] %s251_s8 }
  0x1f   : > { %s239_s2 = scalar_lea.sflag [#allocation3], %s238_s14  ;;  %260 = sbr.rel (%p1232_p8) target bundleno = 187 (0xbb), region = 32 }
  0x20   : > { %867 = dma.hbm_to_vmem [thread:$0]  (!%p865_p9), %s250_s25, 128, %s252_s8, %s239_s2  }
  0x21   : > { %s1273_s10 = sand.u32 (!%p1232_p8), 1, %s1126_s19  }
  0x22   : > { %s801_s13 = sshll.u32 (!%p1232_p8), %s1273_s10, 3  ;;  %s263_s17 = scalar_lea.sflag (!%p1232_p8), [#allocation3], %s1273_s10 }
  0x23   : > { %s1277_s15 = scalar_lea.vmem (!%p1232_p8), [#allocation2], %s801_s13 }
  0x24   : > { %1101 = dma.done.wait (%p1219_p4), %s263_s17, 128  }
  0x25   : > { %1103 = vsyncadd (%p1219_p4), %s263_s17, 4294967168 }
  0x26   : > { %1105 = dma.done.wait (%p87_p1), [#allocation6], 128  }
  0x27   : > { %1107 = vsyncadd (%p87_p1), [#allocation6], 4294967168  ;;  %s1287_s2 = scalar_lea.vmem [#allocation7], %s801_s13  ;;  %s1289_s25 = scalar_lea.vmem [#allocation8], %s801_s13 }
  0x28   : > { %p805_p8 = scmp.ne.s32.totalorder %s1134_s21, 0 }
  0x2a   : > { %313 = sbr.rel (%p805_p8) target bundleno = 49 (0x31), region = 44 }
  0x2f   : > { %v314_v0 = vld [vmem:[#allocation5] sm:$0xff] }
  0x30   : > { %315 = vst [vmem:[#allocation10] sm:$0xff] %v314_v0 }
  0x31 PF: > { %v1295_v5 = vld [vmem:[%s1427_s0] sm:$0x1]  ;;  %v1145_v8 = vmov 0.0   ;;  %v358_v35 = vld [vmem:[%s1277_s15 + $0x1] sm:$0x1]  ;;  %s840_s11 = sshll.u32 %s1134_s21, 3 }
  0x32   : > { %v326_v11 = vld [vmem:[%s1277_s15] sm:$0x1]  ;;  %v390_v57 = vld [vmem:[%s1277_s15 + $0x2] sm:$0x1]  ;;  %s622_s29 = scalar_lea.hbm %s1431_s4, %s840_s11  ;;  %s595_s30 = sand.u32 1, %s1208_s24  }
  0x33   : > { %s624_s21 = sshll.u32 %s1289_s25, 4  ;;  %s626_s7 = sshll.u32 %s622_s29, 4  ;;  %s625_s21 = int_to_ptr.vmem [resolvable:$true] %s624_s21  ;;  %s627_s7 = int_to_ptr.hbm [resolvable:$true] %s626_s7 }
  0x34   : > { %s1354_s17 = scalar_lea.hbm %s1430_s3, %s840_s11  ;;  %s596_s6 = scalar_lea.sflag [#allocation9], %s595_s30 }
  0x35   : > { %s611_s26 = sshll.u32 %s1354_s17, 4  ;;  %s1006_s11 = sshra.s32 %s627_s7, 4  ;;  %s1007_s11 = int_to_ptr.hbm [resolvable:$true] %s1006_s11  ;;  %s612_s26 = int_to_ptr.hbm [resolvable:$true] %s611_s26 }
  0x36   : > { %s1008_s14 = scalar_lea.hbm %s1007_s11, 8  ;;  %s1012_s8 = scalar_lea.hbm %s1431_s4, 32 }
  0x37   : > { %v318_v1 = vld [vmem:[#allocation10 + $0x1] sm:$0x1]  ;;  %v317_v2 = vld [vmem:[#allocation10] sm:$0x1]  ;;  %v322_v3 = vld [vmem:[#allocation10 + $0x5] sm:$0x1]  ;;  %p1009_p1 = scmp.ne.s32.totalorder %s1007_s11, %s1008_s14  ;;  %p1013_p11 = scmp.lt.s32.totalorder %s1007_s11, %s1431_s4 }
  0x38   : > { %v324_v4 = vld [vmem:[#allocation10 + $0x7] sm:$0x1]  ;;  %v327_v6 = vmul.f32 0.8, %v318_v1  ;;  %v319_v7 = vld [vmem:[#allocation10 + $0x2] sm:$0x1]  ;;  %p1014_p12 = scmp.lt.s32.totalorder %s1012_s8, %s1008_s14 }
  0x39   : > { %vm325_vm0 = vcmp.gt.f32.partialorder %v324_v4, 0.5  ;;  %v339_v10 = vmul.f32 0.95, %v322_v3  ;;  %v330_v13 = vmul.f32 0.9, %v317_v2  ;;  %v806_v17 = vadd.f32 -1.0, %v319_v7  ;;  %p1010_p4 = pnand %p1009_p1, %p1253_p3 }
  0x3a   : > { %v328_v9 = vsel %vm325_vm0, 1.0, %v1145_v8  ;;  %v321_v14 = vld [vmem:[#allocation10 + $0x4] sm:$0x1]  ;;  %v320_v16 = vld [vmem:[#allocation10 + $0x3] sm:$0x1]  ;;  %p1015_p13 = por %p1014_p12, %p1013_p11 }
  0x3b   : > { %v329_v12 = vadd.f32 %v328_v9, %v327_v6  ;;  %v340_v18 = vadd.f32 %v339_v10, %v326_v11  ;;  %v341_v20 = vmul.f32 0.8, %v321_v14  ;;  %v323_v21 = vld [vmem:[#allocation10 + $0x6] sm:$0x1]  ;;  %v344_v22 = vmul.f32 0.9, %v320_v16  ;;  %p1011_p10 = pneg %p1010_p4 }
  0x3c   : > { %v807_v28 = vadd.f32 -1.0, %v323_v21 }
  0x3d   : > { %v331_v15 = vadd.f32 %v329_v12, %v1295_v5  ;;  %v359_v30 = vmul.f32 0.8, %v329_v12  ;;  %v371_v34 = vmul.f32 0.95, %v340_v18  ;;  %p1016_p0 = pnand %p1015_p13, %p1011_p10 }
  0x3f   : > { %v332_v19 = vadd.f32 %v331_v15, %v330_v13  ;;  %v372_v42 = vadd.f32 %v371_v34, %v358_v35 }
  0x41   : > { %vm333_vm1 = vcmp.gt.f32.partialorder %v332_v19, 1.5  ;;  %v403_v58 = vmul.f32 0.95, %v372_v42 }
  0x42   : > { %v335_v23 = vsel %vm333_vm1, 3.0, %v806_v17  ;;  %v342_v24 = vsel %vm333_vm1, %v340_v18, 0.0  ;;  %v808_v25 = vsel %vm333_vm1, 1.0, %v1145_v8  ;;  %v422_v18 = vld [vmem:[%s1277_s15 + $0x3] sm:$0x1] }
  0x43   : > { %vm336_vm2 = vcmp.le.f32.partialorder %v335_v23, 0.0  ;;  %v343_v26 = vadd.f32 %v342_v24, %v341_v20  ;;  %354 = vst [vmem:[%s1289_s25] sm:$0x1] %v808_v25  ;;  %v810_v40 = vadd.f32 -1.0, %v335_v23  ;;  %v404_v1 = vadd.f32 %v403_v58, %v390_v57 }
  0x44   : > { %v337_v27 = vsel %vm336_vm2, %v332_v19, 0.0 }
  0x45   : > { %v345_v29 = vadd.f32 %v344_v22, %v343_v26  ;;  %v338_v31 = vsel %vm333_vm1, 0.0, %v337_v27  ;;  %v373_v44 = vmul.f32 0.8, %v343_v26  ;;  %v435_v19 = vmul.f32 0.95, %v404_v1 }
  0x46   : > { %v362_v37 = vmul.f32 0.9, %v338_v31 }
  0x47   : > { %vm346_vm3 = vcmp.gt.f32.partialorder %v345_v29, 0.8  ;;  %v436_v26 = vadd.f32 %v435_v19, %v422_v18 }
  0x48   : > { %v348_v32 = vsel %vm346_vm3, 2.0, %v807_v28  ;;  %v809_v33 = vsel %vm346_vm3, 1.0, %v1145_v8 }
  0x49   : > { %vm349_vm4 = vcmp.le.f32.partialorder %v348_v32, 0.0  ;;  %v361_v36 = vadd.f32 %v809_v33, %v359_v30  ;;  %357 = vst [vmem:[%s1287_s2] sm:$0x1] %v809_v33  ;;  %v811_v50 = vadd.f32 -1.0, %v348_v32 }
  0x4a   : > { %v350_v38 = vsel %vm349_vm4, %v345_v29, 0.0 }
  0x4b   : > { %v363_v39 = vadd.f32 %v361_v36, %v1295_v5  ;;  %v351_v41 = vsel %vm346_vm3, 0.0, %v350_v38  ;;  %v391_v53 = vmul.f32 0.8, %v361_v36  ;;  %v467_v36 = vmul.f32 0.95, %v436_v26 }
  0x4c   : > { %v376_v45 = vmul.f32 0.9, %v351_v41  ;;  %v454_v38 = vld [vmem:[%s1277_s15 + $0x4] sm:$0x1] }
  0x4d   : > { %v364_v43 = vadd.f32 %v363_v39, %v362_v37 }
  0x4f   : > { %vm365_vm5 = vcmp.gt.f32.partialorder %v364_v43, 1.5 }
  0x50   : > { %v367_v46 = vsel %vm365_vm5, 3.0, %v810_v40  ;;  %v374_v47 = vsel %vm365_vm5, %v372_v42, 0.0  ;;  %v812_v48 = vsel %vm365_vm5, 1.0, %v1145_v8 }
  0x51   : > { %vm368_vm6 = vcmp.le.f32.partialorder %v367_v46, 0.0  ;;  %v375_v49 = vadd.f32 %v374_v47, %v373_v44  ;;  %386 = vst [vmem:[%s1289_s25 + $0x1] sm:$0x1] %v812_v48  ;;  %v814_v63 = vadd.f32 -1.0, %v367_v46 }
  0x52   : > { %v369_v51 = vsel %vm368_vm6, %v364_v43, 0.0  ;;  %v468_v43 = vadd.f32 %v467_v36, %v454_v38 }
  0x53   : > { %v377_v52 = vadd.f32 %v376_v45, %v375_v49  ;;  %v370_v54 = vsel %vm365_vm5, 0.0, %v369_v51  ;;  %v405_v3 = vmul.f32 0.8, %v375_v49  ;;  %v486_v49 = vld [vmem:[%s1277_s15 + $0x5] sm:$0x1] }
  0x54   : > { %v394_v60 = vmul.f32 0.9, %v370_v54  ;;  %v499_v47 = vmul.f32 0.95, %v468_v43 }
  0x55   : > { %vm378_vm7 = vcmp.gt.f32.partialorder %v377_v52, 0.8 }
  0x56   : > { %v380_v55 = vsel %vm378_vm7, 2.0, %v811_v50  ;;  %v813_v56 = vsel %vm378_vm7, 1.0, %v1145_v8  ;;  %v500_v54 = vadd.f32 %v499_v47, %v486_v49 }
  0x57   : > { %vm381_vm8 = vcmp.le.f32.partialorder %v380_v55, 0.0  ;;  %v393_v59 = vadd.f32 %v813_v56, %v391_v53  ;;  %389 = vst [vmem:[%s1287_s2 + $0x1] sm:$0x1] %v813_v56  ;;  %v815_v11 = vadd.f32 -1.0, %v380_v55 }
  0x58   : > { %v382_v61 = vsel %vm381_vm8, %v377_v52, 0.0 }
  0x59   : > { %v395_v62 = vadd.f32 %v393_v59, %v1295_v5  ;;  %v383_v0 = vsel %vm378_vm7, 0.0, %v382_v61  ;;  %v423_v14 = vmul.f32 0.8, %v393_v59  ;;  %v531_v59 = vmul.f32 0.95, %v500_v54 }
  0x5a   : > { %v408_v4 = vmul.f32 0.9, %v383_v0  ;;  %v518_v61 = vld [vmem:[%s1277_s15 + $0x6] sm:$0x1] }
  0x5b   : > { %v396_v2 = vadd.f32 %v395_v62, %v394_v60 }
  0x5d   : > { %vm397_vm9 = vcmp.gt.f32.partialorder %v396_v2, 1.5 }
  0x5e   : > { %v399_v6 = vsel %vm397_vm9, 3.0, %v814_v63  ;;  %v406_v7 = vsel %vm397_vm9, %v404_v1, 0.0  ;;  %v816_v9 = vsel %vm397_vm9, 1.0, %v1145_v8 }
  0x5f   : > { %vm400_vm10 = vcmp.le.f32.partialorder %v399_v6, 0.0  ;;  %v407_v10 = vadd.f32 %v406_v7, %v405_v3  ;;  %418 = vst [vmem:[%s1289_s25 + $0x2] sm:$0x1] %v816_v9  ;;  %v818_v24 = vadd.f32 -1.0, %v399_v6  ;;  %v532_v3 = vadd.f32 %v531_v59, %v518_v61 }
  0x60   : > { %v401_v12 = vsel %vm400_vm10, %v396_v2, 0.0 }
  0x61   : > { %v409_v13 = vadd.f32 %v408_v4, %v407_v10  ;;  %v402_v15 = vsel %vm397_vm9, 0.0, %v401_v12  ;;  %v437_v28 = vmul.f32 0.8, %v407_v10  ;;  %v563_v9 = vmul.f32 0.95, %v532_v3 }
  0x62   : > { %v426_v21 = vmul.f32 0.9, %v402_v15 }
  0x63   : > { %vm410_vm11 = vcmp.gt.f32.partialorder %v409_v13, 0.8 }
  0x64   : > { %v412_v16 = vsel %vm410_vm11, 2.0, %v815_v11  ;;  %v817_v17 = vsel %vm410_vm11, 1.0, %v1145_v8  ;;  %v550_v11 = vld [vmem:[%s1277_s15 + $0x7] sm:$0x1]  ;;  %s609_s15 = sshll.u32 %s1287_s2, 4  ;;  %s610_s15 = int_to_ptr.vmem [resolvable:$true] %s609_s15 }
  0x65   : > { %vm413_vm12 = vcmp.le.f32.partialorder %v412_v16, 0.0  ;;  %v425_v20 = vadd.f32 %v817_v17, %v423_v14  ;;  %421 = vst [vmem:[%s1287_s2 + $0x2] sm:$0x1] %v817_v17  ;;  %v819_v34 = vadd.f32 -1.0, %v412_v16 }
  0x66   : > { %v414_v22 = vsel %vm413_vm12, %v409_v13, 0.0  ;;  %v1331_v13 = vadd.f32 %v563_v9, %v550_v11 }
  0x67   : > { %v427_v23 = vadd.f32 %v425_v20, %v1295_v5  ;;  %v415_v25 = vsel %vm410_vm11, 0.0, %v414_v22  ;;  %v455_v39 = vmul.f32 0.8, %v425_v20 }
  0x68   : > { %v440_v29 = vmul.f32 0.9, %v415_v25  ;;  %587 = vst [vmem:[#allocation10 + $0x5] sm:$0x1] %v1331_v13 }
  0x69   : > { %v428_v27 = vadd.f32 %v427_v23, %v426_v21 }
  0x6b   : > { %vm429_vm13 = vcmp.gt.f32.partialorder %v428_v27, 1.5 }
  0x6c   : > { %v431_v30 = vsel %vm429_vm13, 3.0, %v818_v24  ;;  %v438_v31 = vsel %vm429_vm13, %v436_v26, 0.0  ;;  %v820_v32 = vsel %vm429_vm13, 1.0, %v1145_v8 }
  0x6d   : > { %vm432_vm14 = vcmp.le.f32.partialorder %v431_v30, 0.0  ;;  %v439_v33 = vadd.f32 %v438_v31, %v437_v28  ;;  %450 = vst [vmem:[%s1289_s25 + $0x3] sm:$0x1] %v820_v32  ;;  %v822_v50 = vadd.f32 -1.0, %v431_v30 }
  0x6e   : > { %v433_v35 = vsel %vm432_vm14, %v428_v27, 0.0 }
  0x6f   : > { %v441_v37 = vadd.f32 %v440_v29, %v439_v33  ;;  %v434_v40 = vsel %vm429_vm13, 0.0, %v433_v35  ;;  %v469_v53 = vmul.f32 0.8, %v439_v33 }
  0x70   : > { %v458_v45 = vmul.f32 0.9, %v434_v40 }
  0x71   : > { %vm442_vm15 = vcmp.gt.f32.partialorder %v441_v37, 0.8 }
  0x72   : > { %v444_v41 = vsel %vm442_vm15, 2.0, %v819_v34  ;;  %v821_v42 = vsel %vm442_vm15, 1.0, %v1145_v8 }
  0x73   : > { %vm445_vm0 = vcmp.le.f32.partialorder %v444_v41, 0.0  ;;  %v457_v44 = vadd.f32 %v821_v42, %v455_v39  ;;  %453 = vst [vmem:[%s1287_s2 + $0x3] sm:$0x1] %v821_v42  ;;  %v823_v62 = vadd.f32 -1.0, %v444_v41 }
  0x74   : > { %v446_v46 = vsel %vm445_vm0, %v441_v37, 0.0 }
  0x75   : > { %v459_v48 = vadd.f32 %v457_v44, %v1295_v5  ;;  %v447_v51 = vsel %vm442_vm15, 0.0, %v446_v46  ;;  %v487_v2 = vmul.f32 0.8, %v457_v44 }
  0x76   : > { %v472_v55 = vmul.f32 0.9, %v447_v51 }
  0x77   : > { %v460_v52 = vadd.f32 %v459_v48, %v458_v45 }
  0x79   : > { %vm461_vm1 = vcmp.gt.f32.partialorder %v460_v52, 1.5 }
  0x7a   : > { %v463_v56 = vsel %vm461_vm1, 3.0, %v822_v50  ;;  %v470_v57 = vsel %vm461_vm1, %v468_v43, 0.0  ;;  %v824_v58 = vsel %vm461_vm1, 1.0, %v1145_v8 }
  0x7b   : > { %vm464_vm2 = vcmp.le.f32.partialorder %v463_v56, 0.0  ;;  %v471_v60 = vadd.f32 %v470_v57, %v469_v53  ;;  %482 = vst [vmem:[%s1289_s25 + $0x4] sm:$0x1] %v824_v58  ;;  %v826_v15 = vadd.f32 -1.0, %v463_v56 }
  0x7c   : > { %v465_v63 = vsel %vm464_vm2, %v460_v52, 0.0 }
  0x7d   : > { %v466_v0 = vsel %vm461_vm1, 0.0, %v465_v63  ;;  %v473_v1 = vadd.f32 %v472_v55, %v471_v60  ;;  %v501_v18 = vmul.f32 0.8, %v471_v60 }
  0x7e   : > { %v490_v7 = vmul.f32 0.9, %v466_v0 }
  0x7f   : > { %vm474_vm3 = vcmp.gt.f32.partialorder %v473_v1, 0.8 }
  0x80   : > { %v476_v4 = vsel %vm474_vm3, 2.0, %v823_v62  ;;  %v825_v6 = vsel %vm474_vm3, 1.0, %v1145_v8 }
  0x81   : > { %vm477_vm4 = vcmp.le.f32.partialorder %v476_v4, 0.0  ;;  %v489_v10 = vadd.f32 %v825_v6, %v487_v2  ;;  %485 = vst [vmem:[%s1287_s2 + $0x4] sm:$0x1] %v825_v6  ;;  %v827_v24 = vadd.f32 -1.0, %v476_v4 }
  0x82   : > { %v478_v12 = vsel %vm477_vm4, %v473_v1, 0.0 }
  0x83   : > { %v491_v14 = vadd.f32 %v489_v10, %v1295_v5  ;;  %v479_v16 = vsel %vm474_vm3, 0.0, %v478_v12  ;;  %v519_v27 = vmul.f32 0.8, %v489_v10 }
  0x84   : > { %v504_v19 = vmul.f32 0.9, %v479_v16 }
  0x85   : > { %v492_v17 = vadd.f32 %v491_v14, %v490_v7 }
  0x87   : > { %vm493_vm5 = vcmp.gt.f32.partialorder %v492_v17, 1.5 }
  0x88   : > { %v495_v20 = vsel %vm493_vm5, 3.0, %v826_v15  ;;  %v502_v21 = vsel %vm493_vm5, %v500_v54, 0.0  ;;  %v828_v22 = vsel %vm493_vm5, 1.0, %v1145_v8 }
  0x89   : > { %vm496_vm6 = vcmp.le.f32.partialorder %v495_v20, 0.0  ;;  %v503_v23 = vadd.f32 %v502_v21, %v501_v18  ;;  %514 = vst [vmem:[%s1289_s25 + $0x5] sm:$0x1] %v828_v22  ;;  %v830_v35 = vadd.f32 -1.0, %v495_v20 }
  0x8a   : > { %v497_v25 = vsel %vm496_vm6, %v492_v17, 0.0 }
  0x8b   : > { %v505_v26 = vadd.f32 %v504_v19, %v503_v23  ;;  %v498_v28 = vsel %vm493_vm5, 0.0, %v497_v25  ;;  %v533_v38 = vmul.f32 0.8, %v503_v23 }
  0x8c   : > { %v522_v32 = vmul.f32 0.9, %v498_v28 }
  0x8d   : > { %vm506_vm7 = vcmp.gt.f32.partialorder %v505_v26, 0.8 }
  0x8e   : > { %v508_v29 = vsel %vm506_vm7, 2.0, %v827_v24  ;;  %v829_v30 = vsel %vm506_vm7, 1.0, %v1145_v8 }
  0x8f   : > { %vm509_vm8 = vcmp.le.f32.partialorder %v508_v29, 0.0  ;;  %v521_v31 = vadd.f32 %v829_v30, %v519_v27  ;;  %517 = vst [vmem:[%s1287_s2 + $0x5] sm:$0x1] %v829_v30  ;;  %v831_v45 = vadd.f32 -1.0, %v508_v29 }
  0x90   : > { %v510_v33 = vsel %vm509_vm8, %v505_v26, 0.0 }
  0x91   : > { %v523_v34 = vadd.f32 %v521_v31, %v1295_v5  ;;  %v511_v36 = vsel %vm506_vm7, 0.0, %v510_v33  ;;  %v551_v47 = vmul.f32 0.8, %v521_v31 }
  0x92   : > { %v536_v39 = vmul.f32 0.9, %v511_v36 }
  0x93   : > { %v524_v37 = vadd.f32 %v523_v34, %v522_v32 }
  0x95   : > { %vm525_vm9 = vcmp.gt.f32.partialorder %v524_v37, 1.5 }
  0x96   : > { %v527_v40 = vsel %vm525_vm9, 3.0, %v830_v35  ;;  %v534_v41 = vsel %vm525_vm9, %v532_v3, 0.0  ;;  %v832_v42 = vsel %vm525_vm9, 1.0, %v1145_v8 }
  0x97   : > { %vm528_vm10 = vcmp.le.f32.partialorder %v527_v40, 0.0  ;;  %v535_v43 = vadd.f32 %v534_v41, %v533_v38  ;;  %546 = vst [vmem:[%s1289_s25 + $0x6] sm:$0x1] %v832_v42  ;;  %v834_v56 = vadd.f32 -1.0, %v527_v40 }
  0x98   : > { %v529_v44 = vsel %vm528_vm10, %v524_v37, 0.0 }
  0x99   : > { %v537_v46 = vadd.f32 %v536_v39, %v535_v43  ;;  %v530_v48 = vsel %vm525_vm9, 0.0, %v529_v44  ;;  %v565_v58 = vmul.f32 0.8, %v535_v43 }
  0x9a   : > { %v554_v52 = vmul.f32 0.9, %v530_v48 }
  0x9b   : > { %vm538_vm11 = vcmp.gt.f32.partialorder %v537_v46, 0.8 }
  0x9c   : > { %v833_v49 = vsel %vm538_vm11, 1.0, %v1145_v8  ;;  %v540_v50 = vsel %vm538_vm11, 2.0, %v831_v45 }
  0x9d   : > { %v553_v51 = vadd.f32 %v833_v49, %v551_v47  ;;  %549 = vst [vmem:[%s1287_s2 + $0x6] sm:$0x1] %v833_v49  ;;  %vm541_vm12 = vcmp.le.f32.partialorder %v540_v50, 0.0  ;;  %v835_v0 = vadd.f32 -1.0, %v540_v50 }
  0x9e   : > { %v542_v53 = vsel %vm541_vm12, %v537_v46, 0.0 }
  0x9f   : > { %v555_v54 = vadd.f32 %v553_v51, %v1295_v5  ;;  %583 = vst [vmem:[#allocation10 + $0x1] sm:$0x1] %v553_v51  ;;  %v543_v55 = vsel %vm538_vm11, 0.0, %v542_v53 }
  0xa0   : > { %v568_v59 = vmul.f32 0.9, %v543_v55 }
  0xa1   : > { %v556_v57 = vadd.f32 %v555_v54, %v554_v52 }
  0xa3   : > { %vm557_vm13 = vcmp.gt.f32.partialorder %v556_v57, 1.5 }
  0xa4   : > { %v836_v5 = vsel %vm557_vm13, 1.0, %v1145_v8  ;;  %v566_v60 = vsel %vm557_vm13, %v1331_v13, 0.0  ;;  %v559_v61 = vsel %vm557_vm13, 3.0, %v834_v56 }
  0xa5   : > { %578 = vst [vmem:[%s1289_s25 + $0x7] sm:$0x1] %v836_v5  ;;  %v567_v62 = vadd.f32 %v566_v60, %v565_v58  ;;  %vm560_vm14 = vcmp.le.f32.partialorder %v559_v61, 0.0 }
  0xa6   : > { %v561_v63 = vsel %vm560_vm14, %v556_v57, 0.0  ;;  %584 = vst [vmem:[#allocation10 + $0x2] sm:$0x1] %v559_v61 }
  0xa7   : > { %1019 = shalt.err (!%p1016_p0)
}
  0xa8   : > { %853 = dma.vmem_to_hbm [thread:$0]  (%p1253_p3), %s625_s21, 128, %s627_s7, %s596_s6   ;;  %v569_v1 = vadd.f32 %v568_v59, %v567_v62  ;;  %586 = vst [vmem:[#allocation10 + $0x4] sm:$0x1] %v567_v62  ;;  %v562_v2 = vsel %vm557_vm13, 0.0, %v561_v63 }
  0xa9   : > { %582 = vst [vmem:[#allocation10] sm:$0x1] %v562_v2  ;;  %s1146_s30 = smov [#allocation10]   ;;  %s640_s11 = sshll.u32 %s1432_s5, 4  ;;  %s641_s11 = int_to_ptr.hbm [resolvable:$true] %s640_s11 }
  0xaa   : > { %s1375_s17 = sshll.u32 %s1146_s30, 4  ;;  %vm570_vm15 = vcmp.gt.f32.partialorder %v569_v1, 0.8  ;;  %s591_s21 = scalar_lea.sflag [#allocation4], %s1273_s10  ;;  %s639_s17 = int_to_ptr.vmem [resolvable:$true] %s1375_s17 }
  0xab   : > { %v837_v3 = vsel %vm570_vm15, 1.0, %v1145_v8  ;;  %v572_v4 = vsel %vm570_vm15, 2.0, %v835_v0  ;;  %s1034_s7 = sshra.s32 %s612_s26, 4  ;;  %s1040_s13 = scalar_lea.hbm %s1430_s3, 32  ;;  %s1035_s7 = int_to_ptr.hbm [resolvable:$true] %s1034_s7 }
  0xac   : > { %581 = vst [vmem:[%s1287_s2 + $0x7] sm:$0x1] %v837_v3  ;;  %vm573_vm0 = vcmp.le.f32.partialorder %v572_v4, 0.0  ;;  %s1036_s6 = scalar_lea.hbm %s1035_s7, 8  ;;  %p1041_p8 = scmp.lt.s32.totalorder %s1035_s7, %s1430_s3 }
  0xad   : > { %589 = vst [vmem:[#allocation10 + $0x7] sm:$0x1] %v837_v3  ;;  %v574_v6 = vsel %vm573_vm0, %v569_v1, 0.0  ;;  %p1037_p5 = scmp.ne.s32.totalorder %s1035_s7, %s1036_s6  ;;  %p1042_p1 = scmp.lt.s32.totalorder %s1040_s13, %s1036_s6 }
  0xaf   : > { %p1038_p7 = pnand %p1037_p5, %p1253_p3  ;;  %p1043_p4 = por %p1042_p1, %p1041_p8 }
  0xb1   : > { %p1039_p9 = pneg %p1038_p7 }
  0xb3   : > { %p1044_p10 = pnand %p1043_p4, %p1039_p9 }
  0xb5   : > { %1047 = shalt.err (!%p1044_p10)
}
  0xb6   : > { %852 = dma.vmem_to_hbm [thread:$0]  (%p1253_p3), %s610_s15, 128, %s612_s26, %s591_s21   ;;  %v575_v8 = vsel %vm570_vm15, 0.0, %v574_v6  ;;  %588 = vst [vmem:[#allocation10 + $0x6] sm:$0x1] %v572_v4 }
  0xb7   : > { %585 = vst [vmem:[#allocation10 + $0x3] sm:$0x1] %v575_v8 }
  0xb8   : > { %855 = dma.vmem_to_hbm [thread:$0]  (%p138_p2), %s639_s17, 128, %s641_s11, [#allocation9]  }
  0xb9   : > { %1109 = dma.done.wait (%p138_p2), [#allocation9], 128  }
  0xba   : > { %1111 = vsyncadd (%p138_p2), [#allocation9], 4294967168 }
  0xbb PF: > { %p880_p11 = scmp.ge.s32.totalorder %s1142_s23, 2  ;;  %s657_s12 = sand.u32 1, %s1122_s18  }
  0xbc   : > { %s658_s10 = scalar_lea.sflag [#allocation4], %s657_s12 }
  0xbd   : > { %p869_p12 = pnand %p880_p11, %p1224_p6 }
  0xbf   : > { %p870_p3 = pneg %p869_p12 }
  0xc1   : > { %1113 = dma.done.wait (%p870_p3), %s658_s10, 128  }
  0xc2   : > { %1115 = vsyncadd (%p870_p3), %s658_s10, 4294967168  ;;  %s1441_s2 = sadd.s32 4294967294, %s1142_s23  }
  0xc3   : > { %s667_s15 = sand.u32 1, %s1441_s2  }
  0xc4   : > { %s668_s26 = scalar_lea.sflag [#allocation9], %s667_s15 }
  0xc5   : > { %1117 = dma.done.wait (%p870_p3), %s668_s26, 128  }
  0xc6   : > { %1119 = vsyncadd (%p870_p3), %s668_s26, 4294967168  ;;  %s26_s23 = sadd.s32 1, %s1142_s23   ;;  %s1442_s18 = smov %s1126_s19 }
  0xc7   : > { %p23_p2 = scmp.ge.s32.totalorder %s26_s23, 6   ;;  %s1443_s19 = smov %s1130_s20 }
  0xc8   : > { %s1444_s20 = smov %s1262_s16  ;;  %s1445_s21 = smov %s1138_s22 }
  0xc9   : > { %s1446_s22 = smov %s1448_s9  ;;  %25 = sbr.rel (!%p23_p2) target bundleno = 11 (0xb), region = 115 }
  0xce   :  { %674 = vsyncpa [#allocation3], 1 }
  0xcf   :  { %676 = vsyncpa [#allocation3 + $0x1], 1 }
  0xd0   :  { %677 = vsyncpa [#allocation6], 1 }
  0xd1   :  { %678 = vsyncpa [#allocation4], 1 }
  0xd2   :  { %680 = vsyncpa [#allocation4 + $0x1], 1 }
  0xd3   :  { %681 = vsyncpa [#allocation9], 1 }
  0xd4   :  { %683 = vsyncpa [#allocation9 + $0x1], 1 }

</bundles_post_ra>
